<compile_context>
chip_gen: v7x
topology: tpu7x:2x2x1
jax: 0.10.0
libtpu: 0.0.40
codegen_flags: <defaults>
</compile_context>

<pallas_src>
import numpy as np

import jax
import jax.numpy as jnp
from jax import lax
from jax.experimental import pallas as pl
from jax.experimental.pallas import tpu as pltpu


def _round_up(x, m):
    return ((x + m - 1) // m) * m


def _pick_block_b(B, K, target_rows=256):
    """Largest divisor of B such that the tile is spec-legal and TB*K >= ~256."""
    cap = min(B, max(1, target_rows // max(K, 1)))
    divs = [d for d in range(1, cap + 1) if B % d == 0]
    # prefer tiles whose batch dim is a multiple of 8 (sublane aligned) or full B
    good = [d for d in divs if d % 8 == 0 or d == B]
    return max(good) if good else max(divs)


def _make_kernel(K, emit_joint):
    """Kernel factory; K (num boxes) and emit_joint are trace-time constants."""

    def kernel(v_ref, q_ref, wv_ref, bv_ref, wq_ref, bq_ref, wl_ref, bl_ref,
               e_ref, e2_ref, fp_ref, ftp_ref, *out_refs):
        if emit_joint:
            f_ref, sig_ref, logits_ref, joint_ref = out_refs
        else:
            f_ref, sig_ref, logits_ref = out_refs

        v_flat = v_ref[...]                                      # (TB*K, Dv)
        q2 = q_ref[...]                                          # (TB, Dq)

        # ---- FCNet projections: Linear + ReLU, one big MXU matmul each ----
        vp = jnp.maximum(
            jnp.dot(v_flat, wv_ref[...], preferred_element_type=jnp.float32)
            + bv_ref[...], 0.0)                                  # (TB*K, H)
        qp = jnp.maximum(
            jnp.dot(q2, wq_ref[...], preferred_element_type=jnp.float32)
            + bq_ref[...], 0.0)                                  # (TB, H)

        # Replicate each question row K times (row b*K+k of qp_rep == qp[b])
        # via a 0/1 expansion matrix on the MXU.
        qp_rep = jnp.dot(e_ref[...], qp,
                         preferred_element_type=jnp.float32)     # (TB*K, H)

        joint = vp * qp_rep                                      # (TB*K, H)
        if emit_joint:
            joint_ref[...] = joint.astype(joint_ref.dtype)

        # ---- logits: <joint_row, wl> + bl  (VPU multiply + lane reduce) ----
        bl = bl_ref[0, 0]                                        # scalar (SMEM)
        rowsum = jnp.sum(joint * wl_ref[...], axis=-1,
                         keepdims=True)                          # (TB*K, 1)
        # Scatter the flat logit column into a lane-dense (TB, Kpad) tile:
        # (E2 @ (rowsum * Fp))[b, k] = rowsum[b*K + k] for k < K, 0 otherwise.
        logits_pad = jnp.dot(e2_ref[...], rowsum * fp_ref[...],
                             preferred_element_type=jnp.float32) + bl  # (TB, Kpad)

        # ---- softmax over the K real boxes (pad lanes masked out) ----
        lane = lax.broadcasted_iota(jnp.int32, logits_pad.shape, 1)
        masked = jnp.where(lane < K, logits_pad, -1e30)
        m = jnp.max(masked, axis=-1, keepdims=True)
        e = jnp.exp(masked - m)
        p_pad = e / jnp.sum(e, axis=-1, keepdims=True)           # (TB, Kpad)

        # ---- attended feature f[b] = sum_k p[b,k] * v[b,k,:] as one matmul ----
        # W[b, r] = p[b, r mod K] if r // K == b else 0   ->   f = W @ v_flat
        w_rows = e2_ref[...] * jnp.dot(p_pad, ftp_ref[...],
                                       preferred_element_type=jnp.float32)
        f = jnp.dot(w_rows, v_flat,
                    preferred_element_type=jnp.float32)          # (TB, Dv)

        f_ref[...] = f.astype(f_ref.dtype)
        sig_ref[...] = p_pad.astype(sig_ref.dtype)
        logits_ref[...] = logits_pad.astype(logits_ref.dtype)

    return kernel


def img_attention(v, q, params, *, block_b=None, return_joint=True):
    """Forward pass of ImgAttention (softmax att_mode, eval mode)."""
    B, K, Dv = v.shape
    Dq = q.shape[1]
    H = params["wv"].shape[1]
    dtype = v.dtype

    TB = _pick_block_b(B, K) if block_b is None else block_b
    assert B % TB == 0, "block_b must divide the batch"
    nb = B // TB
    TBK = TB * K
    KP = _round_up(K, 128)       # lane-dense width for the K-sized outputs

    # Tiny constant 0/1 scatter/gather matrices (host-side numpy: no in-kernel
    # integer div/mod, no relayouts).  r = b*K + k indexes flattened rows.
    r = np.arange(TBK)
    b_of_r = r // K
    k_of_r = r % K
    E = (b_of_r[:, None] == np.arange(TB)[None, :]).astype(np.float32)   # (TBK, TB)
    E2 = np.ascontiguousarray(E.T)                                       # (TB, TBK)
    Fp = (k_of_r[:, None] == np.arange(KP)[None, :]).astype(np.float32)  # (TBK, KP)
    Ftp = np.ascontiguousarray(Fp.T)                                     # (KP, TBK)

    in_specs = [
        pl.BlockSpec((TBK, Dv), lambda b: (b, 0)),   # v (flattened)
        pl.BlockSpec((TB, Dq), lambda b: (b, 0)),    # q
        pl.BlockSpec((Dv, H), lambda b: (0, 0)),     # Wv
        pl.BlockSpec((1, H), lambda b: (0, 0)),      # bv
        pl.BlockSpec((Dq, H), lambda b: (0, 0)),     # Wq
        pl.BlockSpec((1, H), lambda b: (0, 0)),      # bq
        pl.BlockSpec((1, H), lambda b: (0, 0)),      # wl
        pl.BlockSpec(memory_space=pltpu.MemorySpace.SMEM),   # bl scalar
        pl.BlockSpec((TBK, TB), lambda b: (0, 0)),   # E
        pl.BlockSpec((TB, TBK), lambda b: (0, 0)),   # E2
        pl.BlockSpec((TBK, KP), lambda b: (0, 0)),   # Fp
        pl.BlockSpec((KP, TBK), lambda b: (0, 0)),   # Ftp
    ]
    out_specs = [
        pl.BlockSpec((TB, Dv), lambda b: (b, 0)),    # f
        pl.BlockSpec((TB, KP), lambda b: (b, 0)),    # sig_maps (lane padded)
        pl.BlockSpec((TB, KP), lambda b: (b, 0)),    # logits   (lane padded)
    ]
    out_shape = [
        jax.ShapeDtypeStruct((B, Dv), dtype),
        jax.ShapeDtypeStruct((B, KP), jnp.float32),
        jax.ShapeDtypeStruct((B, KP), jnp.float32),
    ]
    if return_joint:
        out_specs.append(pl.BlockSpec((TBK, H), lambda b: (b, 0)))
        out_shape.append(jax.ShapeDtypeStruct((B * K, H), dtype))

    outs = pl.pallas_call(
        _make_kernel(K, return_joint),
        out_shape=tuple(out_shape),
        grid=(nb,),
        in_specs=in_specs,
        out_specs=tuple(out_specs),
        compiler_params=pltpu.CompilerParams(
            dimension_semantics=("parallel",)),      # batch axis is independent
    )(v.reshape(B * K, Dv), q,
      params["wv"], params["bv"], params["wq"], params["bq"],
      params["wl"], params["bl"],
      jnp.asarray(E), jnp.asarray(E2), jnp.asarray(Fp), jnp.asarray(Ftp))

    if return_joint:
        f, sig_pad, logits_pad, joint_flat = outs
        joint = joint_flat.reshape(B, K, H)
    else:
        f, sig_pad, logits_pad = outs
        joint = None

    sig_maps = sig_pad[:, :K]
    logits = logits_pad[:, :K]
    maps = sig_maps.reshape(B, K, 1)     # maps.view(-1, K, 1) in the torch code
    return f, maps, sig_maps, logits, joint


def reference(v, q, params):
    """Pure-JAX reference matching the PyTorch forward (eval mode)."""
    vp = jnp.maximum(v @ params["wv"] + params["bv"], 0.0)
    qp = jnp.maximum(q @ params["wq"] + params["bq"], 0.0)
    joint = vp * qp[:, None, :]
    logits = (joint @ params["wl"].T + params["bl"][0]).reshape(v.shape[0], -1)
    sig_maps = jax.nn.softmax(logits, axis=1)
    maps = sig_maps[..., None]
    f = (v * maps).sum(1)
    return f, maps, sig_maps, logits, joint


def init_params(key, v_dim, q_dim, num_hid):
    ks = jax.random.split(key, 6)
    s = 0.1
    return {
        "wv": (s * jax.random.normal(ks[0], (v_dim, num_hid))).astype(jnp.float32),
        "bv": (s * jax.random.normal(ks[1], (1, num_hid))).astype(jnp.float32),
        "wq": (s * jax.random.normal(ks[2], (q_dim, num_hid))).astype(jnp.float32),
        "bq": (s * jax.random.normal(ks[3], (1, num_hid))).astype(jnp.float32),
        "wl": (s * jax.random.normal(ks[4], (1, num_hid))).astype(jnp.float32),
        "bl": (s * jax.random.normal(ks[5], (1, 1))).astype(jnp.float32),
    }


if __name__ == "__main__":
    B, K, V_DIM, Q_DIM, NUM_HID = 64, 8, 32, 32, 32

    key = jax.random.PRNGKey(0)
    k_v, k_q, k_p = jax.random.split(key, 3)
    v = jax.random.normal(k_v, (B, K, V_DIM), dtype=jnp.float32)
    q = jax.random.normal(k_q, (B, Q_DIM), dtype=jnp.float32)
    params = init_params(k_p, V_DIM, Q_DIM, NUM_HID)

    outs = img_attention(v, q, params)                  # full outputs
    outs = jax.block_until_ready(outs)

    refs = reference(v, q, params)
    for o, r in zip(outs, refs):
        assert o.shape == r.shape, (o.shape, r.shape)
        assert jnp.allclose(o, r, atol=2e-5, rtol=2e-5), "mismatch vs reference"

    # Fast path: skip the large joint_repr HBM writeback.
    f2, maps2, sig2, logits2, joint2 = img_attention(v, q, params,
                                                     return_joint=False)
    jax.block_until_ready((f2, maps2, sig2, logits2))
    assert joint2 is None
    assert jnp.allclose(f2, refs[0], atol=2e-5, rtol=2e-5)
    assert jnp.allclose(sig2, refs[2], atol=2e-5, rtol=2e-5)

    print("KERNEL_OK")
</pallas_src>

<mosaic_0001>
module attributes {stable_mosaic.version = 11 : i64} {
  func.func @kernel(%arg0: i32, %arg1: memref<256x32xf32, #tpu.memory_space<vmem>>, %arg2: memref<32x32xf32, #tpu.memory_space<vmem>>, %arg3: memref<32x32xf32, #tpu.memory_space<vmem>>, %arg4: memref<1x32xf32, #tpu.memory_space<vmem>>, %arg5: memref<32x32xf32, #tpu.memory_space<vmem>>, %arg6: memref<1x32xf32, #tpu.memory_space<vmem>>, %arg7: memref<1x32xf32, #tpu.memory_space<vmem>>, %arg8: memref<1x1xf32, #tpu.memory_space<smem>>, %arg9: memref<256x32xf32, #tpu.memory_space<vmem>>, %arg10: memref<32x256xf32, #tpu.memory_space<vmem>>, %arg11: memref<256x128xf32, #tpu.memory_space<vmem>>, %arg12: memref<128x256xf32, #tpu.memory_space<vmem>>, %arg13: memref<32x32xf32, #tpu.memory_space<vmem>>, %arg14: memref<32x128xf32, #tpu.memory_space<vmem>>, %arg15: memref<32x128xf32, #tpu.memory_space<vmem>>, %arg16: memref<256x32xf32, #tpu.memory_space<vmem>>) attributes {dimension_semantics = [#tpu.dimension_semantics<parallel>], iteration_bounds = array<i64: 2>, scalar_prefetch = 0 : i64, scratch_operands = 0 : i64, tpu.core_type = #tpu.core_type<tc>, window_params = [{transform_indices = @transform_0, window_bounds = array<i64: 256, 32>}, {transform_indices = @transform_1, window_bounds = array<i64: 32, 32>}, {pipeline_mode = #tpu.pipeline_mode<synchronous>, transform_indices = @transform_2, window_bounds = array<i64: 32, 32>}, {pipeline_mode = #tpu.pipeline_mode<synchronous>, transform_indices = @transform_3, window_bounds = array<i64: 1, 32>}, {pipeline_mode = #tpu.pipeline_mode<synchronous>, transform_indices = @transform_4, window_bounds = array<i64: 32, 32>}, {pipeline_mode = #tpu.pipeline_mode<synchronous>, transform_indices = @transform_5, window_bounds = array<i64: 1, 32>}, {pipeline_mode = #tpu.pipeline_mode<synchronous>, transform_indices = @transform_6, window_bounds = array<i64: 1, 32>}, {transform_indices = @transform_7, window_bounds = array<i64: 1, 1>}, {pipeline_mode = #tpu.pipeline_mode<synchronous>, transform_indices = @transform_8, window_bounds = array<i64: 256, 32>}, {pipeline_mode = #tpu.pipeline_mode<synchronous>, transform_indices = @transform_9, window_bounds = array<i64: 32, 256>}, {pipeline_mode = #tpu.pipeline_mode<synchronous>, transform_indices = @transform_10, window_bounds = array<i64: 256, 128>}, {pipeline_mode = #tpu.pipeline_mode<synchronous>, transform_indices = @transform_11, window_bounds = array<i64: 128, 256>}, {transform_indices = @transform_12, window_bounds = array<i64: 32, 32>}, {transform_indices = @transform_13, window_bounds = array<i64: 32, 128>}, {transform_indices = @transform_14, window_bounds = array<i64: 32, 128>}, {transform_indices = @transform_15, window_bounds = array<i64: 256, 32>}]} {
    %c0 = arith.constant 0 : index
    %c0_0 = arith.constant 0 : index
    %0 = vector.load %arg1[%c0, %c0_0] : memref<256x32xf32, #tpu.memory_space<vmem>>, vector<256x32xf32>
    %c0_1 = arith.constant 0 : index
    %c0_2 = arith.constant 0 : index
    %1 = vector.load %arg2[%c0_1, %c0_2] : memref<32x32xf32, #tpu.memory_space<vmem>>, vector<32x32xf32>
    %c0_3 = arith.constant 0 : index
    %c0_4 = arith.constant 0 : index
    %2 = vector.load %arg3[%c0_3, %c0_4] : memref<32x32xf32, #tpu.memory_space<vmem>>, vector<32x32xf32>
    %cst = arith.constant dense<0.000000e+00> : vector<256x32xf32>
    %3 = tpu.matmul %0, %2, %cst {dimension_numbers = #tpu.dot_dimension_numbers<[1], [0], [0], [1], [0, 0, 1, 1], [], []>} : vector<256x32xf32>, vector<32x32xf32>, vector<256x32xf32> -> vector<256x32xf32>
    %c0_5 = arith.constant 0 : index
    %c0_6 = arith.constant 0 : index
    %4 = vector.load %arg4[%c0_5, %c0_6] : memref<1x32xf32, #tpu.memory_space<vmem>>, vector<1x32xf32>
    %5 = vector.broadcast %4 : vector<1x32xf32> to vector<256x32xf32>
    %6 = arith.addf %3, %5 : vector<256x32xf32>
    %cst_7 = arith.constant 0.000000e+00 : f32
    %7 = vector.broadcast %cst_7 : f32 to vector<256x32xf32>
    %8 = arith.maximumf %6, %7 : vector<256x32xf32>
    %c0_8 = arith.constant 0 : index
    %c0_9 = arith.constant 0 : index
    %9 = vector.load %arg5[%c0_8, %c0_9] : memref<32x32xf32, #tpu.memory_space<vmem>>, vector<32x32xf32>
    %cst_10 = arith.constant dense<0.000000e+00> : vector<32x32xf32>
    %10 = tpu.matmul %1, %9, %cst_10 {dimension_numbers = #tpu.dot_dimension_numbers<[1], [0], [0], [1], [0, 0, 1, 1], [], []>} : vector<32x32xf32>, vector<32x32xf32>, vector<32x32xf32> -> vector<32x32xf32>
    %c0_11 = arith.constant 0 : index
    %c0_12 = arith.constant 0 : index
    %11 = vector.load %arg6[%c0_11, %c0_12] : memref<1x32xf32, #tpu.memory_space<vmem>>, vector<1x32xf32>
    %12 = vector.broadcast %11 : vector<1x32xf32> to vector<32x32xf32>
    %13 = arith.addf %10, %12 : vector<32x32xf32>
    %cst_13 = arith.constant 0.000000e+00 : f32
    %14 = vector.broadcast %cst_13 : f32 to vector<32x32xf32>
    %15 = arith.maximumf %13, %14 : vector<32x32xf32>
    %c0_14 = arith.constant 0 : index
    %c0_15 = arith.constant 0 : index
    %16 = vector.load %arg9[%c0_14, %c0_15] : memref<256x32xf32, #tpu.memory_space<vmem>>, vector<256x32xf32>
    %cst_16 = arith.constant dense<0.000000e+00> : vector<256x32xf32>
    %17 = tpu.matmul %16, %15, %cst_16 {dimension_numbers = #tpu.dot_dimension_numbers<[1], [0], [0], [1], [0, 0, 1, 1], [], []>} : vector<256x32xf32>, vector<32x32xf32>, vector<256x32xf32> -> vector<256x32xf32>
    %18 = arith.mulf %8, %17 : vector<256x32xf32>
    %c0_17 = arith.constant 0 : index
    %c0_18 = arith.constant 0 : index
    %19 = vector.load %arg16[%c0_17, %c0_18] : memref<256x32xf32, #tpu.memory_space<vmem>>, vector<256x32xf32>
    tpu.vector_store %arg16[%c0_17, %c0_18], %18 {strides = array<i32>} : memref<256x32xf32, #tpu.memory_space<vmem>>, vector<256x32xf32>,
    %c0_19 = arith.constant 0 : index
    %c0_20 = arith.constant 0 : index
    %20 = memref.load %arg8[%c0_19, %c0_20] : memref<1x1xf32, #tpu.memory_space<smem>>
    %c0_21 = arith.constant 0 : index
    %c0_22 = arith.constant 0 : index
    %21 = vector.load %arg7[%c0_21, %c0_22] : memref<1x32xf32, #tpu.memory_space<vmem>>, vector<1x32xf32>
    %22 = vector.broadcast %21 : vector<1x32xf32> to vector<256x32xf32>
    %23 = arith.mulf %18, %22 : vector<256x32xf32>
    %cst_23 = arith.constant dense<0.000000e+00> : vector<256xf32>
    %24 = vector.multi_reduction <add>, %23, %cst_23 [1] : vector<256x32xf32> to vector<256xf32>
    %25 = vector.shape_cast %24 : vector<256xf32> to vector<256x1xf32>
    %c0_24 = arith.constant 0 : index
    %c0_25 = arith.constant 0 : index
    %26 = vector.load %arg10[%c0_24, %c0_25] : memref<32x256xf32, #tpu.memory_space<vmem>>, vector<32x256xf32>
    %c0_26 = arith.constant 0 : index
    %c0_27 = arith.constant 0 : index
    %27 = vector.load %arg11[%c0_26, %c0_27] : memref<256x128xf32, #tpu.memory_space<vmem>>, vector<256x128xf32>
    %28 = vector.broadcast %25 : vector<256x1xf32> to vector<256x128xf32>
    %29 = arith.mulf %28, %27 : vector<256x128xf32>
    %cst_28 = arith.constant dense<0.000000e+00> : vector<32x128xf32>
    %30 = tpu.matmul %26, %29, %cst_28 {dimension_numbers = #tpu.dot_dimension_numbers<[1], [0], [0], [1], [0, 0, 1, 1], [], []>} : vector<32x256xf32>, vector<256x128xf32>, vector<32x128xf32> -> vector<32x128xf32>
    %31 = vector.broadcast %20 : f32 to vector<32x128xf32>
    %32 = arith.addf %30, %31 : vector<32x128xf32>
    %33 = tpu.iota {dimensions = array<i32: 1>} : vector<32x128xi32>
    %c8_i32 = arith.constant 8 : i32
    %34 = vector.broadcast %c8_i32 : i32 to vector<32x128xi32>
    %35 = arith.cmpi slt, %33, %34 : vector<32x128xi32>
    %cst_29 = arith.constant -1.000000e+30 : f32
    %36 = vector.broadcast %cst_29 : f32 to vector<32x128xf32>
    %37 = arith.select %35, %32, %36 : vector<32x128xi1>, vector<32x128xf32>
    %cst_30 = arith.constant dense<0xFF800000> : vector<32xf32>
    %38 = vector.multi_reduction <maximumf>, %37, %cst_30 [1] : vector<32x128xf32> to vector<32xf32>
    %39 = vector.shape_cast %38 : vector<32xf32> to vector<32x1xf32>
    %40 = vector.broadcast %39 : vector<32x1xf32> to vector<32x128xf32>
    %41 = arith.subf %37, %40 : vector<32x128xf32>
    %42 = math.exp %41 : vector<32x128xf32>
    %cst_31 = arith.constant dense<0.000000e+00> : vector<32xf32>
    %43 = vector.multi_reduction <add>, %42, %cst_31 [1] : vector<32x128xf32> to vector<32xf32>
    %44 = vector.shape_cast %43 : vector<32xf32> to vector<32x1xf32>
    %45 = vector.broadcast %44 : vector<32x1xf32> to vector<32x128xf32>
    %46 = arith.divf %42, %45 : vector<32x128xf32>
    %c0_32 = arith.constant 0 : index
    %c0_33 = arith.constant 0 : index
    %47 = vector.load %arg10[%c0_32, %c0_33] : memref<32x256xf32, #tpu.memory_space<vmem>>, vector<32x256xf32>
    %c0_34 = arith.constant 0 : index
    %c0_35 = arith.constant 0 : index
    %48 = vector.load %arg12[%c0_34, %c0_35] : memref<128x256xf32, #tpu.memory_space<vmem>>, vector<128x256xf32>
    %cst_36 = arith.constant dense<0.000000e+00> : vector<32x256xf32>
    %49 = tpu.matmul %46, %48, %cst_36 {dimension_numbers = #tpu.dot_dimension_numbers<[1], [0], [0], [1], [0, 0, 1, 1], [], []>} : vector<32x128xf32>, vector<128x256xf32>, vector<32x256xf32> -> vector<32x256xf32>
    %50 = arith.mulf %47, %49 : vector<32x256xf32>
    %cst_37 = arith.constant dense<0.000000e+00> : vector<32x32xf32>
    %51 = tpu.matmul %50, %0, %cst_37 {dimension_numbers = #tpu.dot_dimension_numbers<[1], [0], [0], [1], [0, 0, 1, 1], [], []>} : vector<32x256xf32>, vector<256x32xf32>, vector<32x32xf32> -> vector<32x32xf32>
    %c0_38 = arith.constant 0 : index
    %c0_39 = arith.constant 0 : index
    %52 = vector.load %arg13[%c0_38, %c0_39] : memref<32x32xf32, #tpu.memory_space<vmem>>, vector<32x32xf32>
    tpu.vector_store %arg13[%c0_38, %c0_39], %51 {strides = array<i32>} : memref<32x32xf32, #tpu.memory_space<vmem>>, vector<32x32xf32>,
    %c0_40 = arith.constant 0 : index
    %c0_41 = arith.constant 0 : index
    %53 = vector.load %arg14[%c0_40, %c0_41] : memref<32x128xf32, #tpu.memory_space<vmem>>, vector<32x128xf32>
    tpu.vector_store %arg14[%c0_40, %c0_41], %46 {strides = array<i32>} : memref<32x128xf32, #tpu.memory_space<vmem>>, vector<32x128xf32>,
    %c0_42 = arith.constant 0 : index
    %c0_43 = arith.constant 0 : index
    %54 = vector.load %arg15[%c0_42, %c0_43] : memref<32x128xf32, #tpu.memory_space<vmem>>, vector<32x128xf32>
    tpu.vector_store %arg15[%c0_42, %c0_43], %32 {strides = array<i32>} : memref<32x128xf32, #tpu.memory_space<vmem>>, vector<32x128xf32>,
    return
  }
  func.func @transform_0(%arg0: i32) -> (i32, i32) {
    %c0_i32 = arith.constant 0 : i32
    %c0_i32_0 = arith.constant 0 : i32
    return %arg0, %c0_i32 : i32, i32
  }
  func.func @transform_1(%arg0: i32) -> (i32, i32) {
    %c0_i32 = arith.constant 0 : i32
    %c0_i32_0 = arith.constant 0 : i32
    return %arg0, %c0_i32 : i32, i32
  }
  func.func @transform_2(%arg0: i32) -> (i32, i32) {
    %c0_i32 = arith.constant 0 : i32
    %c0_i32_0 = arith.constant 0 : i32
    %c0_i32_1 = arith.constant 0 : i32
    return %c0_i32, %c0_i32_0 : i32, i32
  }
  func.func @transform_3(%arg0: i32) -> (i32, i32) {
    %c0_i32 = arith.constant 0 : i32
    %c0_i32_0 = arith.constant 0 : i32
    %c0_i32_1 = arith.constant 0 : i32
    return %c0_i32, %c0_i32_0 : i32, i32
  }
  func.func @transform_4(%arg0: i32) -> (i32, i32) {
    %c0_i32 = arith.constant 0 : i32
    %c0_i32_0 = arith.constant 0 : i32
    %c0_i32_1 = arith.constant 0 : i32
    return %c0_i32, %c0_i32_0 : i32, i32
  }
  func.func @transform_5(%arg0: i32) -> (i32, i32) {
    %c0_i32 = arith.constant 0 : i32
    %c0_i32_0 = arith.constant 0 : i32
    %c0_i32_1 = arith.constant 0 : i32
    return %c0_i32, %c0_i32_0 : i32, i32
  }
  func.func @transform_6(%arg0: i32) -> (i32, i32) {
    %c0_i32 = arith.constant 0 : i32
    %c0_i32_0 = arith.constant 0 : i32
    %c0_i32_1 = arith.constant 0 : i32
    return %c0_i32, %c0_i32_0 : i32, i32
  }
  func.func @transform_7(%arg0: i32) -> (i32, i32) {
    %c0_i32 = arith.constant 0 : i32
    %c0_i32_0 = arith.constant 0 : i32
    %c0_i32_1 = arith.constant 0 : i32
    return %c0_i32, %c0_i32_0 : i32, i32
  }
  func.func @transform_8(%arg0: i32) -> (i32, i32) {
    %c0_i32 = arith.constant 0 : i32
    %c0_i32_0 = arith.constant 0 : i32
    %c0_i32_1 = arith.constant 0 : i32
    return %c0_i32, %c0_i32_0 : i32, i32
  }
  func.func @transform_9(%arg0: i32) -> (i32, i32) {
    %c0_i32 = arith.constant 0 : i32
    %c0_i32_0 = arith.constant 0 : i32
    %c0_i32_1 = arith.constant 0 : i32
    return %c0_i32, %c0_i32_0 : i32, i32
  }
  func.func @transform_10(%arg0: i32) -> (i32, i32) {
    %c0_i32 = arith.constant 0 : i32
    %c0_i32_0 = arith.constant 0 : i32
    %c0_i32_1 = arith.constant 0 : i32
    return %c0_i32, %c0_i32_0 : i32, i32
  }
  func.func @transform_11(%arg0: i32) -> (i32, i32) {
    %c0_i32 = arith.constant 0 : i32
    %c0_i32_0 = arith.constant 0 : i32
    %c0_i32_1 = arith.constant 0 : i32
    return %c0_i32, %c0_i32_0 : i32, i32
  }
  func.func @transform_12(%arg0: i32) -> (i32, i32) {
    %c0_i32 = arith.constant 0 : i32
    %c0_i32_0 = arith.constant 0 : i32
    return %arg0, %c0_i32 : i32, i32
  }
  func.func @transform_13(%arg0: i32) -> (i32, i32) {
    %c0_i32 = arith.constant 0 : i32
    %c0_i32_0 = arith.constant 0 : i32
    return %arg0, %c0_i32 : i32, i32
  }
  func.func @transform_14(%arg0: i32) -> (i32, i32) {
    %c0_i32 = arith.constant 0 : i32
    %c0_i32_0 = arith.constant 0 : i32
    return %arg0, %c0_i32 : i32, i32
  }
  func.func @transform_15(%arg0: i32) -> (i32, i32) {
    %c0_i32 = arith.constant 0 : i32
    %c0_i32_0 = arith.constant 0 : i32
    return %arg0, %c0_i32 : i32, i32
  }
}

</mosaic_0001>

<bundles_post_ra>
// kernel: tpu_custom_call.1
= control target key start
LH: loop header
LB: loop body
LE: loop exit
PB: predicated region body
PF: predicated region fallthrough
CT: control target
= control target key end

     0   :  { %s4099_s0 = inlined_call_operand.vmem [shape: f32[512,32], index: 0, kind: input, shape index: {}]   ;;  %s4100_s1 = inlined_call_operand.vmem [shape: f32[64,32], index: 1, kind: input, shape index: {}]   ;;  %s4101_s2 = inlined_call_operand.vmem [shape: f32[32,32], index: 2, kind: input, shape index: {}]   ;;  %s4102_s3 = inlined_call_operand.vmem [shape: f32[1,32], index: 3, kind: input, shape index: {}]   ;;  %s4103_s4 = inlined_call_operand.vmem [shape: f32[32,32], index: 4, kind: input, shape index: {}]   ;;  %s4104_s5 = inlined_call_operand.vmem [shape: f32[1,32], index: 5, kind: input, shape index: {}]   ;;  %s4105_s6 = inlined_call_operand.vmem [shape: f32[1,32], index: 6, kind: input, shape index: {}]   ;;  %s4106_s7 = inlined_call_operand.<no memory space> [shape: f32[1,1], index: 7, kind: input, shape index: {}]   ;;  %s4107_s8 = inlined_call_operand.vmem [shape: f32[256,32], index: 8, kind: input, shape index: {}]   ;;  %s4108_s9 = inlined_call_operand.vmem [shape: f32[32,256], index: 9, kind: input, shape index: {}]   ;;  %s4109_s10 = inlined_call_operand.vmem [shape: f32[256,128], index: 10, kind: input, shape index: {}]   ;;  %s4110_s11 = inlined_call_operand.vmem [shape: f32[128,256], index: 11, kind: input, shape index: {}]   ;;  %s4111_s12 = inlined_call_operand.vmem [shape: f32[64,32], index: 12, kind: output, shape index: {0}]   ;;  %s4112_s13 = inlined_call_operand.hbm [shape: f32[64,128], index: 13, kind: output, shape index: {1}]   ;;  %s4113_s14 = inlined_call_operand.hbm [shape: f32[64,128], index: 14, kind: output, shape index: {2}]   ;;  %s4114_s15 = inlined_call_operand.vmem [shape: f32[512,32], index: 15, kind: output, shape index: {3}]  }
   0x1   :  { %4122 = sst [smem:[#allocation13_spill]] %s4099_s0 }
   0x2   :  { %4123 = sst [smem:[#allocation14_spill]] %s4100_s1 }
   0x3   :  { %4124 = sst [smem:[#allocation15_spill]] %s4101_s2 }
   0x4   :  { %4125 = sst [smem:[#allocation16_spill]] %s4102_s3 }
   0x5   :  { %21 = sst [smem:[#allocation2]] %s4106_s7 }
   0x6   :  { %22 = vsyncpa [#allocation4], 0 }
   0x7   :  { %24 = vsyncpa [#allocation4 + $0x1], 0 }
   0x8   :  { %25 = vsyncpa [#allocation6], 0 }
   0x9   :  { %27 = vsyncpa [#allocation6 + $0x1], 0  ;;  %s3033_s20 = smov 0   ;;  %s3035_s21 = smov 0  }
   0xa   :  { %s3037_s22 = smov 0   ;;  %s3039_s23 = smov 0  }
   0xb LB: > { %4126 = sst [smem:[#allocation9_spill]] %s2939_s22  ;;  %s3054_s7 = sadd.s32 4294967295, %s2943_s23   ;;  %s2943_s23 = sphi %s3039_s23, %s4150_s23   ;;  %s2939_s22 = sphi %s3037_s22, %s4152_s22   ;;  %s2935_s21 = sphi %s3035_s21, %s4154_s21   ;;  %s2931_s20 = sphi %s3033_s20, %s4153_s20  }
   0xc   : > { %s2259_s24 = sadd.s32 4294967294, %s2943_s23   ;;  %s3058_s25 = sadd.s32 1, %s2943_s23  }
   0xd   : > { %4127 = sst [smem:[#allocation10_spill]] %s3058_s25  ;;  %s328_s26 = sadd.s32 1, %s2939_s22 }
   0xe   : > { %s325_s27 = ssub.s32 %s2943_s23, %s3058_s25  ;;  %p338_p0 = scmp.ne.s32.totalorder %s2939_s22, %s2935_s21 }
   0xf   : > { %p326_p1 = scmp.eq.s32.totalorder %s325_s27, 0  ;;  %p339_p2 = scmp.eq.s32.totalorder %s3054_s7, 1 }
  0x10   : > { %p344_p3 = scmp.ne.s32.totalorder %s2935_s21, %s2931_s20  ;;  %p345_p4 = scmp.eq.s32.totalorder %s2259_s24, 1 }
  0x11   : > { %s3069_s28 = scalar_select %p326_p1, %s2939_s22, %s328_s26  }
  0x12   : > { %p3071_p5 = por %p339_p2, %p338_p0  ;;  %p3075_p6 = por %p345_p4, %p344_p3 }
  0x13   : > { %4128 = sst [smem:[#allocation11_spill]] %s3069_s28  ;;  %p2262_p7 = scmp.ge.s32.totalorder %s2943_s23, 1 }
  0x14   : > { %s4130_s30 = scalar_select %p3075_p6, 1, 0 }
  0x15   : > { %p463_p8 = scmp.lt.s32.totalorder %s2943_s23, 3 }
  0x16   : > { %4131 = sst [smem:[#allocation12_spill]] %s4130_s30 }
  0x17   : > { %p464_p9 = pnand %p2262_p7, %p463_p8 }
  0x18   : > { %s4132_s2 = sld [smem:[#allocation15_spill]] (!%p464_p9)  ;;  %s2265_s27 = sshll.u32 (!%p464_p9), %s3054_s7, 5  ;;  %v958_v6 = vld [vmem:[%s4103_s4] sm:$0xff] (!%p464_p9)  ;;  %v959_v7 = vld [vmem:[%s4103_s4 + $0x8] sm:$0xff] (!%p464_p9)  ;;  %vm604_vm0 = vcmask (!%p464_p9), 261120   ;;  %v960_v9 = vld [vmem:[%s4103_s4 + $0x10] sm:$0xff] (!%p464_p9) }
  0x19   : > { %467 = sbr.rel (%p464_p9) target bundleno = 1688 (0x698), region = 68  ;;  %s2267_s28 = sshll.u32 (!%p464_p9), %s3054_s7, 2  ;;  %v2656_v8 = vpack.c.bf16 (!%p464_p9), %v959_v7, %v958_v6  ;;  %v961_v10 = vld [vmem:[%s4103_s4 + $0x18] sm:$0xff] (!%p464_p9)  ;;  %v1070_v28 = vld [vmem:[%s4107_s8] sm:$0xff] (!%p464_p9) }
  0x1a   : > { %p532_p10 = scmp.lt.s32.totalorder (!%p464_p9), %s2265_s27, 63  ;;  %p3101_p11 = scmp.lt.s32.totalorder (!%p464_p9), %s2267_s28, 7  ;;  %v2660_v15 = vpack.c.bf16 (!%p464_p9), %v961_v10, %v960_v9 }
  0x1b   : > { %s4134_s0 = sld [smem:[#allocation13_spill]] (!%p464_p9)  ;;  %s4135_s1 = sld [smem:[#allocation14_spill]] (!%p464_p9) }
  0x1c   : > { %s4136_s3 = sld [smem:[#allocation16_spill]] (!%p464_p9)  ;;  %s2352_s16 = sshll.u32 (!%p464_p9), %s3054_s7, 9 }
  0x1e   : > { %v593_v0 = vld [vmem:[%s4132_s2] sm:$0xff] (!%p464_p9)  ;;  %v594_v1 = vld [vmem:[%s4132_s2 + $0x8] sm:$0xff] (!%p464_p9)  ;;  %v595_v2 = vld [vmem:[%s4132_s2 + $0x10] sm:$0xff] (!%p464_p9) }
  0x1f   : > { %v2648_v3 = vpack.c.bf16 (!%p464_p9), %v594_v1, %v593_v0  ;;  %v596_v4 = vld [vmem:[%s4132_s2 + $0x18] sm:$0xff] (!%p464_p9)  ;;  %v2306_v0 = vld [vmem:[%s4104_s5] ss:$0 sm:$0xff] (!%p464_p9) }
  0x20   : > { %v2652_v5 = vpack.c.bf16 %v596_v4, %v595_v2  ;;  %s4156_s27 = smov (!%p532_p10, %s2265_s27), 63  ;;  %s4158_s28 = smov (!%p3101_p11, %s2267_s28), 7 }
  0x21   : > { %2768 = vmatprep.subr.bf16.mxu1 %v2648_v3  ;;  %2649 = vmatprep.subr.bf16.mxu0 %v2648_v3  ;;  %s4120_s22 = sshll.u32 %s4156_s27, 3  ;;  %s4119_s19 = sshll.u32 %s4158_s28, 3 }
  0x22   : > { %2770 = vmatpush3.bf16.msra.mxu1 %v2648_v3  ;;  %2651 = vmatpush3.bf16.msra.mxu0 %v2648_v3  ;;  %s3113_s24 = scalar_lea.vmem %s4134_s0, %s4120_s22  ;;  %s541_s26 = scalar_lea.vmem %s4135_s1, %s4119_s19 }
  0x23   : > { %2769 = vmatprep.subr.bf16.mxu1 %v2652_v5  ;;  %2653 = vmatprep.subr.bf16.mxu0 %v2652_v5  ;;  %v3122_v11 = vld [vmem:[%s3113_s24 + $0xd0] sm:$0xff]  ;;  %v3125_v12 = vld [vmem:[%s3113_s24 + $0xd8] sm:$0xff]  ;;  %v585_v14 = vld [vmem:[%s3113_s24 + $0xe0] sm:$0xff]  ;;  %s4137_s30 = sshll.u32 %s4156_s27, 3  ;;  %s1487_s27 = sld [smem:[#allocation2]] }
  0x24   : > { %2569 = vmatprep.mubr.msk.f32.mxu1 %vm604_vm0, %v3122_v11  ;;  %v586_v16 = vld [vmem:[%s3113_s24 + $0xe8] sm:$0xff]  ;;  %v587_v17 = vld [vmem:[%s3113_s24 + $0xf0] sm:$0xff]  ;;  %v588_v18 = vld [vmem:[%s3113_s24 + $0xf8] sm:$0xff]  ;;  %s3460_s17 = scalar_lea.vmem %s4114_s15, %s4137_s30  ;;  %s3814_s22 = sand.u32 1, %s2935_s21  }
  0x25   : > { %v589_v19 = vld [vmem:[%s541_s26] sm:$0xff]  ;;  %v590_v20 = vld [vmem:[%s541_s26 + $0x8] sm:$0xff]  ;;  %v591_v21 = vld [vmem:[%s541_s26 + $0x10] sm:$0xff]  ;;  %s4121_s19 = sshll.u32 %s3814_s22, 5  ;;  %s4012_s0 = scalar_lea.hbm %s4112_s13, %s2352_s16 }
  0x26   : > { %2771 = vmatpush3.bf16.msra.mxu1 %v2652_v5  ;;  %2655 = vmatpush3.bf16.msra.mxu0 %v2652_v5  ;;  %v592_v22 = vld [vmem:[%s541_s26 + $0x18] sm:$0xff]  ;;  %v3156_v23 = vld [vmem:[%s3113_s24] sm:$0xff]  ;;  %v3159_v24 = vld [vmem:[%s3113_s24 + $0x8] sm:$0xff]  ;;  %s3822_s30 = scalar_lea.vmem [#allocation5], %s4121_s19  ;;  %s4017_s1 = scalar_lea.hbm %s4113_s14, %s2352_s16 }
  0x27   : > { %2657 = vmatprep.subr.bf16.mxu1 %v2656_v8  ;;  %2530 = vmatprep.mubr.msk.f32.mxu0 %vm604_vm0, %v3156_v23  ;;  %v3168_v26 = vld [vmem:[%s3113_s24 + $0x10] sm:$0xff]  ;;  %v3171_v27 = vld [vmem:[%s3113_s24 + $0x18] sm:$0xff]  ;;  %v3184_v30 = vld [vmem:[%s3113_s24 + $0x20] sm:$0xff] }
  0x28   : > { %v3187_v31 = vld [vmem:[%s3113_s24 + $0x28] sm:$0xff]  ;;  %v3196_v33 = vld [vmem:[%s3113_s24 + $0x30] sm:$0xff]  ;;  %v3199_v34 = vld [vmem:[%s3113_s24 + $0x38] sm:$0xff] }
  0x29   : > { %2570 = vmatmul.mubr.msk.f32.vlgmr.msra.gmra.mrb[0].mxu1 %vm604_vm0, %v3125_v12  ;;  %2531 = vmatmul.mubr.msk.f32.vlgmr.msra.gmra.mrb[0].mxu0 %vm604_vm0, %v3159_v24  ;;  %v3208_v36 = vld [vmem:[%s3113_s24 + $0x40] sm:$0xff]  ;;  %v3211_v37 = vld [vmem:[%s3113_s24 + $0x48] sm:$0xff]  ;;  %v3220_v39 = vld [vmem:[%s3113_s24 + $0x50] sm:$0xff] }
  0x2a   : > { %2572 = vmatprep.mubr.msk.f32.mxu1 %vm604_vm0, %v585_v14  ;;  %2659 = vmatpush3.bf16.msra.mxu1 %v2656_v8  ;;  %v3223_v40 = vld [vmem:[%s3113_s24 + $0x58] sm:$0xff]  ;;  %v3232_v42 = vld [vmem:[%s3113_s24 + $0x60] sm:$0xff]  ;;  %v3235_v43 = vld [vmem:[%s3113_s24 + $0x68] sm:$0xff] }
  0x2b   : > { %2661 = vmatprep.subr.bf16.mxu1 %v2660_v15  ;;  %2533 = vmatprep.mubr.msk.f32.mxu0 %vm604_vm0, %v3168_v26  ;;  %v3244_v45 = vld [vmem:[%s3113_s24 + $0x70] sm:$0xff]  ;;  %v3247_v46 = vld [vmem:[%s3113_s24 + $0x78] sm:$0xff]  ;;  %v573_v48 = vld [vmem:[%s3113_s24 + $0x80] sm:$0xff] }
  0x2c   : > { %v574_v49 = vld [vmem:[%s3113_s24 + $0x88] sm:$0xff]  ;;  %v575_v50 = vld [vmem:[%s3113_s24 + $0x90] sm:$0xff]  ;;  %v576_v51 = vld [vmem:[%s3113_s24 + $0x98] sm:$0xff] }
  0x2d   : > { %2573 = vmatmul.mubr.msk.f32.gmra.mrb[2].mxu1 %vm604_vm0, %v586_v16  ;;  %2534 = vmatmul.mubr.msk.f32.gmra.mrb[2].mxu0 %vm604_vm0, %v3171_v27  ;;  %v577_v52 = vld [vmem:[%s3113_s24 + $0xa0] sm:$0xff]  ;;  %v578_v53 = vld [vmem:[%s3113_s24 + $0xa8] sm:$0xff]  ;;  %v579_v54 = vld [vmem:[%s3113_s24 + $0xb0] sm:$0xff] }
  0x2e   : > { %2575 = vmatprep.mubr.msk.f32.mxu1 %vm604_vm0, %v587_v17  ;;  %2663 = vmatpush3.bf16.msra.mxu1 %v2660_v15  ;;  %v580_v55 = vld [vmem:[%s3113_s24 + $0xb8] sm:$0xff]  ;;  %v581_v56 = vld [vmem:[%s3113_s24 + $0xc0] sm:$0xff]  ;;  %v582_v57 = vld [vmem:[%s3113_s24 + $0xc8] sm:$0xff] }
  0x2f   : > { %2536 = vmatprep.mubr.msk.f32.mxu0 %vm604_vm0, %v3184_v30 }
  0x31   : > { %2576 = vmatmul.mubr.msk.f32.gmra.mrb[4].mxu1 %vm604_vm0, %v588_v18  ;;  %2537 = vmatmul.mubr.msk.f32.gmra.mrb[4].mxu0 %vm604_vm0, %v3187_v31  ;;  %v1071_v18 = vld [vmem:[%s4107_s8 + $0x8] sm:$0xff] }
  0x32   : > { %2586 = vmatprep.mubr.msk.f32.mxu1 %vm604_vm0, %v589_v19  ;;  %2539 = vmatprep.mubr.msk.f32.mxu0 %vm604_vm0, %v3196_v33  ;;  %v1072_v19 = vld [vmem:[%s4107_s8 + $0x10] sm:$0xff] }
  0x35   : > { %2587 = vmatmul.mubr.msk.f32.vlgmr.msra.gmra.mrb[6].mxu1 %vm604_vm0, %v590_v20  ;;  %2540 = vmatmul.mubr.msk.f32.gmra.mrb[6].mxu0 %vm604_vm0, %v3199_v34  ;;  %v1073_v20 = vld [vmem:[%s4107_s8 + $0x18] sm:$0xff] }
  0x36   : > { %2589 = vmatprep.mubr.msk.f32.mxu1 %vm604_vm0, %v591_v21  ;;  %2542 = vmatprep.mubr.msk.f32.mxu0 %vm604_vm0, %v3208_v36  ;;  %v1074_v21 = vld [vmem:[%s4107_s8 + $0x20] sm:$0xff] }
  0x39   : > { %2590 = vmatmul.mubr.msk.f32.gmra.mrb[8].mxu1 %vm604_vm0, %v592_v22  ;;  %2543 = vmatmul.mubr.msk.f32.gmra.mrb[8].mxu0 %vm604_vm0, %v3211_v37  ;;  %v1075_v22 = vld [vmem:[%s4107_s8 + $0x28] sm:$0xff] }
  0x3a   : > { %2600 = vmatprep.mubr.msk.f32.mxu1 %vm604_vm0, %v1070_v28  ;;  %2545 = vmatprep.mubr.msk.f32.mxu0 %vm604_vm0, %v3220_v39  ;;  %v1076_v28 = vld [vmem:[%s4107_s8 + $0x30] sm:$0xff] }
  0x3d   : > { %2546 = vmatmul.mubr.msk.f32.gmra.mrb[10].mxu0 %vm604_vm0, %v3223_v40 }
  0x3e   : > { %2548 = vmatprep.mubr.msk.f32.mxu0 %vm604_vm0, %v3232_v42 }
  0x41   : > { %2549 = vmatmul.mubr.msk.f32.gmra.mrb[12].mxu0 %vm604_vm0, %v3235_v43 }
  0x42   : > { %2551 = vmatprep.mubr.msk.f32.mxu0 %vm604_vm0, %v3244_v45 }
  0x45   : > { %2552 = vmatmul.mubr.msk.f32.gmra.mrb[14].mxu0 %vm604_vm0, %v3247_v46 }
  0x46   : > { %2554 = vmatprep.mubr.msk.f32.mxu0 %vm604_vm0, %v573_v48  ;;  %v1077_v48 = vld [vmem:[%s4107_s8 + $0x38] sm:$0xff] }
  0x49   : > { %2555 = vmatmul.mubr.msk.f32.gmra.mrb[16].mxu0 %vm604_vm0, %v574_v49  ;;  %v1078_v49 = vld [vmem:[%s4107_s8 + $0x40] sm:$0xff] }
  0x4a   : > { %2557 = vmatprep.mubr.msk.f32.mxu0 %vm604_vm0, %v575_v50  ;;  %v1079_v50 = vld [vmem:[%s4107_s8 + $0x48] sm:$0xff] }
  0x4d   : > { %2558 = vmatmul.mubr.msk.f32.gmra.mrb[18].mxu0 %vm604_vm0, %v576_v51  ;;  %v1080_v51 = vld [vmem:[%s4107_s8 + $0x50] sm:$0xff] }
  0x4e   : > { %2560 = vmatprep.mubr.msk.f32.mxu0 %vm604_vm0, %v577_v52  ;;  %v1081_v52 = vld [vmem:[%s4107_s8 + $0x58] sm:$0xff] }
  0x51   : > { %2561 = vmatmul.mubr.msk.f32.gmra.mrb[20].mxu0 %vm604_vm0, %v578_v53  ;;  %v1082_v53 = vld [vmem:[%s4107_s8 + $0x60] sm:$0xff] }
  0x52   : > { %2563 = vmatprep.mubr.msk.f32.mxu0 %vm604_vm0, %v579_v54  ;;  %v1083_v54 = vld [vmem:[%s4107_s8 + $0x68] sm:$0xff] }
  0x55   : > { %2564 = vmatmul.mubr.msk.f32.gmra.mrb[22].mxu0 %vm604_vm0, %v580_v55  ;;  %v1084_v55 = vld [vmem:[%s4107_s8 + $0x70] sm:$0xff] }
  0x56   : > { %2566 = vmatprep.mubr.msk.f32.mxu0 %vm604_vm0, %v581_v56  ;;  %v1085_v56 = vld [vmem:[%s4107_s8 + $0x78] sm:$0xff] }
  0x59   : > { %2567 = vmatmul.mubr.msk.f32.gmra.mrb[24].mxu0 %vm604_vm0, %v582_v57  ;;  %v1086_v57 = vld [vmem:[%s4107_s8 + $0x80] sm:$0xff] }
  0xfc   : > { %v3275_v58 = vpop.f32.mrb[0].mxu1 }
  0xfd   : > { %v3277_v59 = vpop.f32.mrb[1].mxu1 }
 0x100   : > { %v3279_v60 = vpop.f32.mrb[2].mxu1 }
 0x101   : > { %v3281_v61 = vpop.f32.mrb[3].mxu1 }
 0x104   : > { %v3283_v62 = vpop.f32.mrb[4].mxu1 }
 0x105   : > { %v3285_v63 = vpop.f32.mrb[5].mxu1 }
 0x108   : > { %v2588_v1 = vpop.f32.mrb[6].mxu1 }
 0x109   : > { %v1053_v2 = vadd.f32 %v2588_v1, %v2306_v0  ;;  %v1047_v3 = vpop.f32.mrb[7].mxu1  ;;  %v1088_v1 = vld [vmem:[%s4107_s8 + $0x90] sm:$0xff] }
 0x10a   : > { %v1048_v4 = vadd.f32 %v2306_v0, %v1047_v3  ;;  %v1090_v3 = vld [vmem:[%s4107_s8 + $0xa0] sm:$0xff] }
 0x10b   : > { %v1067_v5 = vmax.f32 %v1053_v2, 0.0  ;;  %v1089_v2 = vld [vmem:[%s4107_s8 + $0x98] sm:$0xff] }
 0x10c   : > { %v1066_v6 = vmax.f32 %v1048_v4, 0.0  ;;  %v2591_v7 = vpop.f32.mrb[8].mxu1  ;;  %v1091_v4 = vld [vmem:[%s4107_s8 + $0xa8] sm:$0xff] }
 0x10d   : > { %v1063_v8 = vadd.f32 %v2591_v7, %v2306_v0  ;;  %v1057_v9 = vpop.f32.mrb[9].mxu1  ;;  %v1094_v7 = vld [vmem:[%s4107_s8 + $0xc0] sm:$0xff] }
 0x10e   : > { %v2664_v10 = vpack.c.bf16 %v1067_v5, %v1066_v6  ;;  %v1058_v14 = vadd.f32 %v2306_v0, %v1057_v9  ;;  %v1087_v0 = vld [vmem:[%s4107_s8 + $0x88] sm:$0xff]  ;;  %v1092_v5 = vld [vmem:[%s4107_s8 + $0xb0] sm:$0xff]  ;;  %v1093_v6 = vld [vmem:[%s4107_s8 + $0xb8] sm:$0xff] }
 0x10f   : > { %v1069_v15 = vmax.f32 %v1063_v8, 0.0  ;;  %v1095_v8 = vld [vmem:[%s4107_s8 + $0xc8] sm:$0xff]  ;;  %v1096_v9 = vld [vmem:[%s4107_s8 + $0xd0] sm:$0xff] }
 0x110   : > { %v1068_v16 = vmax.f32 %v1058_v14, 0.0  ;;  %2665 = vmatprep.subr.bf16.mxu1 %v2664_v10  ;;  %v1098_v14 = vld [vmem:[%s4107_s8 + $0xe0] sm:$0xff] }
 0x111   : > { %2667 = vmatpush3.bf16.msra.mxu1 %v2664_v10  ;;  %v1097_v10 = vld [vmem:[%s4107_s8 + $0xd8] sm:$0xff] }
 0x112   : > { %v2668_v17 = vpack.c.bf16 %v1069_v15, %v1068_v16  ;;  %v1099_v15 = vld [vmem:[%s4107_s8 + $0xe8] sm:$0xff]  ;;  %v1100_v16 = vld [vmem:[%s4107_s8 + $0xf0] sm:$0xff] }
 0x114   : > { %2669 = vmatprep.subr.bf16.mxu1 %v2668_v17 }
 0x115   : > { %2671 = vmatpush3.bf16.msra.mxu1 %v2668_v17  ;;  %v1101_v17 = vld [vmem:[%s4107_s8 + $0xf8] sm:$0xff] }
 0x118   : > { %2601 = vmatmul.mubr.msk.f32.vlgmr.msra.gmra.mrb[10].mxu1 %vm604_vm0, %v1071_v18  ;;  %v2532_v18 = vpop.f32.mrb[0].mxu0 }
 0x119   : > { %2603 = vmatprep.mubr.msk.f32.mxu1 %vm604_vm0, %v1072_v19  ;;  %v767_v19 = vpop.f32.mrb[1].mxu0 }
 0x11c   : > { %2604 = vmatmul.mubr.msk.f32.gmra.mrb[12].mxu1 %vm604_vm0, %v1073_v20  ;;  %v2535_v20 = vpop.f32.mrb[2].mxu0 }
 0x11d   : > { %2606 = vmatprep.mubr.msk.f32.mxu1 %vm604_vm0, %v1074_v21  ;;  %v777_v21 = vpop.f32.mrb[3].mxu0 }
 0x120   : > { %2607 = vmatmul.mubr.msk.f32.gmra.mrb[14].mxu1 %vm604_vm0, %v1075_v22  ;;  %v2538_v22 = vpop.f32.mrb[4].mxu0 }
 0x121   : > { %2609 = vmatprep.mubr.msk.f32.mxu1 %vm604_vm0, %v1076_v28  ;;  %v787_v28 = vpop.f32.mrb[5].mxu0 }
 0x124   : > { %2610 = vmatmul.mubr.msk.f32.gmra.mrb[16].mxu1 %vm604_vm0, %v1077_v48  ;;  %v2541_v48 = vpop.f32.mrb[6].mxu0 }
 0x125   : > { %2612 = vmatprep.mubr.msk.f32.mxu1 %vm604_vm0, %v1078_v49  ;;  %v797_v49 = vpop.f32.mrb[7].mxu0 }
 0x128   : > { %2613 = vmatmul.mubr.msk.f32.gmra.mrb[18].mxu1 %vm604_vm0, %v1079_v50  ;;  %v2544_v50 = vpop.f32.mrb[8].mxu0 }
 0x129   : > { %2615 = vmatprep.mubr.msk.f32.mxu1 %vm604_vm0, %v1080_v51  ;;  %v807_v51 = vpop.f32.mrb[9].mxu0 }
 0x12c   : > { %2616 = vmatmul.mubr.msk.f32.gmra.mrb[20].mxu1 %vm604_vm0, %v1081_v52  ;;  %v3414_v52 = vpop.f32.mrb[10].mxu0 }
 0x12d   : > { %2618 = vmatprep.mubr.msk.f32.mxu1 %vm604_vm0, %v1082_v53  ;;  %v3416_v53 = vpop.f32.mrb[11].mxu0 }
 0x130   : > { %2619 = vmatmul.mubr.msk.f32.gmra.mrb[22].mxu1 %vm604_vm0, %v1083_v54  ;;  %v3418_v54 = vpop.f32.mrb[12].mxu0 }
 0x131   : > { %2621 = vmatprep.mubr.msk.f32.mxu1 %vm604_vm0, %v1084_v55  ;;  %v3420_v55 = vpop.f32.mrb[13].mxu0 }
 0x134   : > { %2622 = vmatmul.mubr.msk.f32.gmra.mrb[24].mxu1 %vm604_vm0, %v1085_v56  ;;  %v3422_v56 = vpop.f32.mrb[14].mxu0 }
 0x135   : > { %2624 = vmatprep.mubr.msk.f32.mxu1 %vm604_vm0, %v1086_v57  ;;  %v3424_v57 = vpop.f32.mrb[15].mxu0 }
 0x138   : > { %2625 = vmatmul.mubr.msk.f32.gmra.mrb[26].mxu1 %vm604_vm0, %v1087_v0  ;;  %v3426_v0 = vpop.f32.mrb[16].mxu0 }
 0x139   : > { %2627 = vmatprep.mubr.msk.f32.mxu1 %vm604_vm0, %v1088_v1  ;;  %v3428_v1 = vpop.f32.mrb[17].mxu0 }
 0x13c   : > { %2628 = vmatmul.mubr.msk.f32.gmra.mrb[28].mxu1 %vm604_vm0, %v1089_v2  ;;  %v3430_v2 = vpop.f32.mrb[18].mxu0 }
 0x13d   : > { %2630 = vmatprep.mubr.msk.f32.mxu1 %vm604_vm0, %v1090_v3  ;;  %v3432_v3 = vpop.f32.mrb[19].mxu0 }
 0x140   : > { %2631 = vmatmul.mubr.msk.f32.gmra.mrb[30].mxu1 %vm604_vm0, %v1091_v4  ;;  %v3434_v4 = vpop.f32.mrb[20].mxu0 }
 0x141   : > { %2633 = vmatprep.mubr.msk.f32.mxu1 %vm604_vm0, %v1092_v5  ;;  %v3436_v5 = vpop.f32.mrb[21].mxu0 }
 0x144   : > { %2634 = vmatmul.mubr.msk.f32.gmra.mrb[32].mxu1 %vm604_vm0, %v1093_v6  ;;  %v3438_v6 = vpop.f32.mrb[22].mxu0 }
 0x145   : > { %2636 = vmatprep.mubr.msk.f32.mxu1 %vm604_vm0, %v1094_v7  ;;  %v3440_v7 = vpop.f32.mrb[23].mxu0 }
 0x148   : > { %2637 = vmatmul.mubr.msk.f32.gmra.mrb[34].mxu1 %vm604_vm0, %v1095_v8  ;;  %v3442_v8 = vpop.f32.mrb[24].mxu0 }
 0x149   : > { %2639 = vmatprep.mubr.msk.f32.mxu1 %vm604_vm0, %v1096_v9  ;;  %v3444_v9 = vpop.f32.mrb[25].mxu0 }
 0x14c   : > { %2640 = vmatmul.mubr.msk.f32.gmra.mrb[36].mxu1 %vm604_vm0, %v1097_v10  ;;  %v3449_v10 = vld [vmem:[%s4136_s3] ss:$0 sm:$0xff]  ;;  %s4146_s3 = sshll.u32 %s3814_s22, 5 }
 0x14d   : > { %2642 = vmatprep.mubr.msk.f32.mxu1 %vm604_vm0, %v1098_v14  ;;  %v773_v14 = vadd.f32 %v2532_v18, %v3449_v10  ;;  %v778_v44 = vadd.f32 %v3449_v10, %v777_v21  ;;  %v793_v13 = vadd.f32 %v2538_v22, %v3449_v10  ;;  %v3466_v18 = vld [vmem:[%s4105_s6] ss:$0 sm:$0xff]  ;;  %v788_v38 = vadd.f32 %v3449_v10, %v787_v28 }
 0x14e   : > { %v798_v28 = vadd.f32 %v3449_v10, %v797_v49 }
 0x14f   : > { %v928_v21 = vmax.f32 %v778_v44, 0.0  ;;  %v931_v22 = vmax.f32 %v793_v13, 0.0 }
 0x150   : > { %2643 = vmatmul.mubr.msk.f32.gmra.mrb[38].mxu1 %vm604_vm0, %v1099_v15  ;;  %v768_v15 = vadd.f32 %v3449_v10, %v767_v19 }
 0x151   : > { %2645 = vmatprep.mubr.msk.f32.mxu1 %vm604_vm0, %v1100_v16  ;;  %v927_v16 = vmax.f32 %v773_v14, 0.0 }
 0x152   : > { %v926_v47 = vmax.f32 %v768_v15, 0.0 }
 0x154   : > { %2646 = vmatmul.mubr.msk.f32.gmra.mrb[40].mxu1 %vm604_vm0, %v1101_v17  ;;  %v783_v17 = vadd.f32 %v2535_v20, %v3449_v10 }
 0x156   : > { %v929_v19 = vmax.f32 %v783_v17, 0.0 }
 0x1eb   : > { %v2602_v41 = vpop.f32.mrb[10].mxu1 }
 0x1ec   : > { %v1424_v20 = vmul.f32 %v2602_v41, %v927_v16  ;;  %v1264_v14 = vpop.f32.mrb[11].mxu1  ;;  %v803_v41 = vadd.f32 %v2541_v48, %v3449_v10 }
 0x1ed   : > { %v1423_v15 = vmul.f32 %v1264_v14, %v926_v47  ;;  %v930_v47 = vmax.f32 %v788_v38, 0.0  ;;  %v932_v14 = vmax.f32 %v798_v28, 0.0 }
 0x1ee   : > { %1456 = vst.msk [vmem:[%s3460_s17 + $0x8] sm:$0xff] %vm604_vm0, %v1424_v20  ;;  %v1496_v35 = vmul.f32 %v3466_v18, %v1424_v20 }
 0x1ef   : > { %1455 = vst.msk [vmem:[%s3460_s17] sm:$0xff] %vm604_vm0, %v1423_v15  ;;  %v2605_v32 = vpop.f32.mrb[12].mxu1  ;;  %v1495_v44 = vmul.f32 %v3466_v18, %v1423_v15  ;;  %v808_v15 = vadd.f32 %v3449_v10, %v807_v51 }
 0x1f0   : > { %v1426_v29 = vmul.f32 %v2605_v32, %v929_v19  ;;  %v1274_v25 = vpop.f32.mrb[13].mxu1  ;;  %v1530_v17 = vsel %vm604_vm0, %v1496_v35, 0.0  ;;  %v813_v32 = vadd.f32 %v2544_v50, %v3449_v10  ;;  %v933_v19 = vmax.f32 %v803_v41, 0.0 }
 0x1f1   : > { %v1425_v16 = vmul.f32 %v1274_v25, %v928_v21  ;;  %1531 = vadd.xlane.f32.xlu1 %v1530_v17  ;;  %v1527_v38 = vsel %vm604_vm0, %v1495_v44, 0.0 }
 0x1f2   : > { %1458 = vst.msk [vmem:[%s3460_s17 + $0x18] sm:$0xff] %vm604_vm0, %v1426_v29  ;;  %v1498_v25 = vmul.f32 %v3466_v18, %v1426_v29  ;;  %v935_v50 = vmax.f32 %v813_v32, 0.0  ;;  %v818_v32 = vadd.f32 %v3449_v10, %v3416_v53 }
 0x1f3   : > { %1457 = vst.msk [vmem:[%s3460_s17 + $0x10] sm:$0xff] %vm604_vm0, %v1425_v16  ;;  %v2608_v13 = vpop.f32.mrb[14].mxu1  ;;  %v1497_v35 = vmul.f32 %v3466_v18, %v1425_v16  ;;  %v934_v16 = vmax.f32 %v808_v15, 0.0  ;;  %v828_v15 = vadd.f32 %v3449_v10, %v3420_v55 }
 0x1f4   : > { %v1428_v48 = vmul.f32 %v2608_v13, %v931_v22  ;;  %v1284_v20 = vpop.f32.mrb[15].mxu1  ;;  %v1536_v44 = vsel %vm604_vm0, %v1498_v25, 0.0 }
 0x1f5   : > { %v1427_v49 = vmul.f32 %v1284_v20, %v930_v47  ;;  %1528 = vadd.xlane.f32.xlu1 %v1527_v38  ;;  %v1533_v21 = vsel %vm604_vm0, %v1497_v35, 0.0  ;;  %v823_v47 = vadd.f32 %v3414_v52, %v3449_v10  ;;  %v833_v52 = vadd.f32 %v3418_v54, %v3449_v10 }
 0x1f6   : > { %1460 = vst.msk [vmem:[%s3460_s17 + $0x28] sm:$0xff] %vm604_vm0, %v1428_v48  ;;  %1534 = vadd.xlane.f32.xlu0 %v1533_v21  ;;  %v1500_v51 = vmul.f32 %v3466_v18, %v1428_v48 }
 0x1f7   : > { %1459 = vst.msk [vmem:[%s3460_s17 + $0x20] sm:$0xff] %vm604_vm0, %v1427_v49  ;;  %v2611_v22 = vpop.f32.mrb[16].mxu1  ;;  %v1499_v17 = vmul.f32 %v3466_v18, %v1427_v49  ;;  %v937_v48 = vmax.f32 %v823_v47, 0.0  ;;  %v939_v54 = vmax.f32 %v833_v52, 0.0  ;;  %v938_v47 = vmax.f32 %v828_v15, 0.0 }
 0x1f8   : > { %v1430_v41 = vmul.f32 %v2611_v22, %v933_v19  ;;  %v1294_v29 = vpop.f32.mrb[17].mxu1  ;;  %v1542_v25 = vsel %vm604_vm0, %v1500_v51, 0.0 }
 0x1f9   : > { %v1429_v28 = vmul.f32 %v1294_v29, %v932_v14  ;;  %1537 = vadd.xlane.f32.xlu1 %v1536_v44  ;;  %v1539_v13 = vsel %vm604_vm0, %v1499_v17, 0.0  ;;  %v936_v14 = vmax.f32 %v818_v32, 0.0  ;;  %v843_v44 = vadd.f32 %v3422_v56, %v3449_v10 }
 0x1fa   : > { %1462 = vst.msk [vmem:[%s3460_s17 + $0x38] sm:$0xff] %vm604_vm0, %v1430_v41  ;;  %1540 = vadd.xlane.f32.xlu0 %v1539_v13  ;;  %v1502_v53 = vmul.f32 %v3466_v18, %v1430_v41  ;;  %v853_v56 = vadd.f32 %v3426_v0, %v3449_v10 }
 0x1fb   : > { %1461 = vst.msk [vmem:[%s3460_s17 + $0x30] sm:$0xff] %vm604_vm0, %v1429_v28  ;;  %v2614_v35 = vpop.f32.mrb[18].mxu1  ;;  %v1501_v19 = vmul.f32 %v3466_v18, %v1429_v28  ;;  %v838_v28 = vadd.f32 %v3449_v10, %v3424_v57 }
 0x1fc   : > { %v1432_v20 = vmul.f32 %v2614_v35, %v935_v50  ;;  %v1304_v38 = vpop.f32.mrb[19].mxu1  ;;  %v1548_v29 = vsel %vm604_vm0, %v1502_v53, 0.0  ;;  %v941_v35 = vmax.f32 %v843_v44, 0.0  ;;  %v848_v53 = vadd.f32 %v3449_v10, %v3428_v1 }
 0x1fd   : > { %v1431_v49 = vmul.f32 %v1304_v38, %v934_v16  ;;  %1543 = vadd.xlane.f32.xlu1 %v1542_v25  ;;  %v1545_v21 = vsel %vm604_vm0, %v1501_v19, 0.0  ;;  %v943_v0 = vmax.f32 %v853_v56, 0.0 }
 0x1fe   : > { %1464 = vst.msk [vmem:[%s3460_s17 + $0x48] sm:$0xff] %vm604_vm0, %v1432_v20  ;;  %1546 = vadd.xlane.f32.xlu0 %v1545_v21  ;;  %v1504_v55 = vmul.f32 %v3466_v18, %v1432_v20  ;;  %v940_v20 = vmax.f32 %v838_v28, 0.0 }
 0x1ff   : > { %1463 = vst.msk [vmem:[%s3460_s17 + $0x40] sm:$0xff] %vm604_vm0, %v1431_v49  ;;  %v2617_v50 = vpop.f32.mrb[20].mxu1  ;;  %v1503_v22 = vmul.f32 %v3466_v18, %v1431_v49 }
 0x200   : > { %v1434_v17 = vmul.f32 %v2617_v50, %v937_v48  ;;  %v1314_v41 = vpop.f32.mrb[21].mxu1  ;;  %v1554_v48 = vsel %vm604_vm0, %v1504_v55, 0.0  ;;  %v863_v50 = vadd.f32 %v3430_v2, %v3449_v10 }
 0x201   : > { %v1433_v51 = vmul.f32 %v1314_v41, %v936_v14  ;;  %1549 = vadd.xlane.f32.xlu1 %v1548_v29  ;;  %v1551_v16 = vsel %vm604_vm0, %v1503_v22, 0.0  ;;  %v942_v22 = vmax.f32 %v848_v53, 0.0  ;;  %v858_v29 = vadd.f32 %v3449_v10, %v3432_v3 }
 0x202   : > { %1466 = vst.msk [vmem:[%s3460_s17 + $0x58] sm:$0xff] %vm604_vm0, %v1434_v17  ;;  %1552 = vadd.xlane.f32.xlu0 %v1551_v16  ;;  %v1506_v57 = vmul.f32 %v3466_v18, %v1434_v17  ;;  %v873_v3 = vadd.f32 %v3434_v4, %v3449_v10  ;;  %v878_v53 = vadd.f32 %v3449_v10, %v3440_v7 }
 0x203   : > { %1465 = vst.msk [vmem:[%s3460_s17 + $0x50] sm:$0xff] %vm604_vm0, %v1433_v51  ;;  %v2620_v13 = vpop.f32.mrb[22].mxu1  ;;  %v1505_v32 = vmul.f32 %v3466_v18, %v1433_v51  ;;  %v944_v56 = vmax.f32 %v858_v29, 0.0  ;;  %v893_v7 = vadd.f32 %v3442_v8, %v3449_v10 }
 0x204   : > { %v1436_v52 = vmul.f32 %v2620_v13, %v939_v54  ;;  %v1324_v19 = vpop.f32.mrb[23].mxu1  ;;  %v1560_v54 = vsel %vm604_vm0, %v1506_v57, 0.0 }
 0x205   : > { %v1435_v38 = vmul.f32 %v1324_v19, %v938_v47  ;;  %1555 = vadd.xlane.f32.xlu1 %v1554_v48  ;;  %v1557_v25 = vsel %vm604_vm0, %v1505_v32, 0.0  ;;  %v945_v47 = vmax.f32 %v863_v50, 0.0  ;;  %v868_v32 = vadd.f32 %v3449_v10, %v3436_v5 }
 0x206   : > { %1468 = vst.msk [vmem:[%s3460_s17 + $0x68] sm:$0xff] %vm604_vm0, %v1436_v52  ;;  %1558 = vadd.xlane.f32.xlu0 %v1557_v25  ;;  %v1508_v1 = vmul.f32 %v3466_v18, %v1436_v52  ;;  %v883_v19 = vadd.f32 %v3438_v6, %v3449_v10  ;;  %v947_v48 = vmax.f32 %v873_v3, 0.0 }
 0x207   : > { %1467 = vst.msk [vmem:[%s3460_s17 + $0x60] sm:$0xff] %vm604_vm0, %v1435_v38  ;;  %v2623_v14 = vpop.f32.mrb[24].mxu1  ;;  %v1507_v49 = vmul.f32 %v3466_v18, %v1435_v38  ;;  %v946_v5 = vmax.f32 %v868_v32, 0.0 }
 0x208   : > { %v1438_v21 = vmul.f32 %v2623_v14, %v941_v35  ;;  %v1334_v15 = vpop.f32.mrb[25].mxu1  ;;  %v1566_v28 = vsel %vm604_vm0, %v1508_v1, 0.0  ;;  %v949_v6 = vmax.f32 %v883_v19, 0.0  ;;  %v948_v1 = vmax.f32 %v878_v53, 0.0 }
 0x209   : > { %v1437_v17 = vmul.f32 %v1334_v15, %v940_v20  ;;  %1561 = vadd.xlane.f32.xlu1 %v1560_v54  ;;  %v1563_v41 = vsel %vm604_vm0, %v1507_v49, 0.0  ;;  %v908_v53 = vadd.f32 %v3449_v10, %v3281_v61 }
 0x20a   : > { %1470 = vst.msk [vmem:[%s3460_s17 + $0x78] sm:$0xff] %vm604_vm0, %v1438_v21  ;;  %1564 = vadd.xlane.f32.xlu0 %v1563_v41  ;;  %v3551_v44 = vmul.f32 %v3466_v18, %v1438_v21 }
 0x20b   : > { %1469 = vst.msk [vmem:[%s3460_s17 + $0x70] sm:$0xff] %vm604_vm0, %v1437_v17  ;;  %v2626_v2 = vpop.f32.mrb[26].mxu1  ;;  %v3556_v55 = vmul.f32 %v3466_v18, %v1437_v17  ;;  %v888_v17 = vadd.f32 %v3449_v10, %v3444_v9 }
 0x20c   : > { %v1440_v51 = vmul.f32 %v2626_v2, %v943_v0  ;;  %v1344_v16 = vpop.f32.mrb[27].mxu1 }
 0x20d   : > { %v1439_v13 = vmul.f32 %v1344_v16, %v942_v22  ;;  %1567 = vadd.xlane.f32.xlu1 %v1566_v28  ;;  %v950_v3 = vmax.f32 %v888_v17, 0.0 }
 0x20e   : > { %1472 = vst.msk [vmem:[%s3460_s17 + $0x88] sm:$0xff] %vm604_vm0, %v1440_v51  ;;  %v1512_v35 = vmul.f32 %v3466_v18, %v1440_v51 }
 0x20f   : > { %1471 = vst.msk [vmem:[%s3460_s17 + $0x80] sm:$0xff] %vm604_vm0, %v1439_v13  ;;  %v2629_v52 = vpop.f32.mrb[28].mxu1  ;;  %v1511_v38 = vmul.f32 %v3466_v18, %v1439_v13  ;;  %v903_v13 = vadd.f32 %v3275_v58, %v3449_v10 }
 0x210   : > { %v1442_v4 = vmul.f32 %v2629_v52, %v945_v47  ;;  %v1578_v57 = vsel %vm604_vm0, %v1512_v35, 0.0  ;;  %v1354_v20 = vpop.f32.mrb[29].mxu1  ;;  %v951_v47 = vmax.f32 %v893_v7, 0.0  ;;  %v898_v35 = vadd.f32 %v3449_v10, %v3277_v59 }
 0x211   : > { %1579 = vadd.xlane.f32.xlu0 %v1578_v57  ;;  %v1441_v25 = vmul.f32 %v1354_v20, %v944_v56  ;;  %v1575_v15 = vsel %vm604_vm0, %v1511_v38, 0.0  ;;  %v953_v20 = vmax.f32 %v903_v13, 0.0  ;;  %v913_v38 = vadd.f32 %v3279_v60, %v3449_v10 }
 0x212   : > { %1474 = vst.msk [vmem:[%s3460_s17 + $0x98] sm:$0xff] %vm604_vm0, %v1442_v4  ;;  %v1514_v0 = vmul.f32 %v3466_v18, %v1442_v4  ;;  %v954_v7 = vmax.f32 %v908_v53, 0.0 }
 0x213   : > { %1473 = vst.msk [vmem:[%s3460_s17 + $0x90] sm:$0xff] %vm604_vm0, %v1441_v25  ;;  %v2632_v14 = vpop.f32.mrb[30].mxu1  ;;  %v1513_v49 = vmul.f32 %v3466_v18, %v1441_v25  ;;  %v952_v25 = vmax.f32 %v898_v35, 0.0 }
 0x214   : > { %v1444_v21 = vmul.f32 %v2632_v14, %v947_v48  ;;  %v1584_v54 = vsel %vm604_vm0, %v1514_v0, 0.0  ;;  %v1364_v50 = vpop.f32.mrb[31].mxu1 }
 0x215   : > { %1576 = vadd.xlane.f32.xlu0 %v1575_v15  ;;  %1585 = vadd.xlane.f32.xlu1 %v1584_v54  ;;  %v1443_v22 = vmul.f32 %v1364_v50, %v946_v5  ;;  %v1581_v41 = vsel %vm604_vm0, %v1513_v49, 0.0  ;;  %v955_v15 = vmax.f32 %v913_v38, 0.0  ;;  %v923_v54 = vadd.f32 %v3283_v62, %v3449_v10 }
 0x216   : > { %1476 = vst.msk [vmem:[%s3460_s17 + $0xa8] sm:$0xff] %vm604_vm0, %v1444_v21  ;;  %v1516_v29 = vmul.f32 %v3466_v18, %v1444_v21 }
 0x217   : > { %1475 = vst.msk [vmem:[%s3460_s17 + $0xa0] sm:$0xff] %vm604_vm0, %v1443_v22  ;;  %v2635_v2 = vpop.f32.mrb[32].mxu1  ;;  %v1515_v8 = vmul.f32 %v3466_v18, %v1443_v22 }
 0x218   : > { %v1446_v51 = vmul.f32 %v2635_v2, %v949_v6  ;;  %v1590_v16 = vsel %vm604_vm0, %v1516_v29, 0.0  ;;  %v1374_v28 = vpop.f32.mrb[33].mxu1 }
 0x219   : > { %1582 = vadd.xlane.f32.xlu0 %v1581_v41  ;;  %1591 = vadd.xlane.f32.xlu1 %v1590_v16  ;;  %v1445_v9 = vmul.f32 %v1374_v28, %v948_v1  ;;  %v1587_v56 = vsel %vm604_vm0, %v1515_v8, 0.0  ;;  %v918_v1 = vadd.f32 %v3449_v10, %v3285_v63  ;;  %v957_v8 = vmax.f32 %v923_v54, 0.0  ;;  %v1647_v54 = vld [vmem:[%s4109_s10 + $0x80] sm:$0xff] }
 0x21a   : > { %1478 = vst.msk [vmem:[%s3460_s17 + $0xb8] sm:$0xff] %vm604_vm0, %v1446_v51  ;;  %v1518_v32 = vmul.f32 %v3466_v18, %v1446_v51 }
 0x21b   : > { %1477 = vst.msk [vmem:[%s3460_s17 + $0xb0] sm:$0xff] %vm604_vm0, %v1445_v9  ;;  %v2638_v52 = vpop.f32.mrb[34].mxu1  ;;  %v1517_v19 = vmul.f32 %v3466_v18, %v1445_v9  ;;  %v956_v63 = vmax.f32 %v918_v1, 0.0  ;;  %v1650_v1 = vld [vmem:[%s4109_s10 + $0x98] sm:$0xff] }
 0x21c   : > { %v1448_v48 = vmul.f32 %v2638_v52, %v951_v47  ;;  %v1596_v4 = vsel %vm604_vm0, %v1518_v32, 0.0  ;;  %v1384_v58 = vpop.f32.mrb[35].mxu1 }
 0x21d   : > { %1588 = vadd.xlane.f32.xlu0 %v1587_v56  ;;  %1597 = vadd.xlane.f32.xlu1 %v1596_v4  ;;  %v1447_v57 = vmul.f32 %v1384_v58, %v950_v3  ;;  %v1593_v59 = vsel %vm604_vm0, %v1517_v19, 0.0  ;;  %v1569_v4 = vsel %vm604_vm0, %v3556_v55, 0.0 }
 0x21e   : > { %1480 = vst.msk [vmem:[%s3460_s17 + $0xc8] sm:$0xff] %vm604_vm0, %v1448_v48  ;;  %v1520_v5 = vmul.f32 %v3466_v18, %v1448_v48  ;;  %v1572_v48 = vsel %vm604_vm0, %v3551_v44, 0.0 }
 0x21f   : > { %1479 = vst.msk [vmem:[%s3460_s17 + $0xc0] sm:$0xff] %vm604_vm0, %v1447_v57  ;;  %v2641_v0 = vpop.f32.mrb[36].mxu1  ;;  %v1519_v6 = vmul.f32 %v3466_v18, %v1447_v57 }
 0x220   : > { %v1450_v14 = vmul.f32 %v2641_v0, %v953_v20  ;;  %v1394_v49 = vpop.f32.mrb[37].mxu1  ;;  %v1602_v60 = vsel %vm604_vm0, %v1520_v5, 0.0 }
 0x221   : > { %v1449_v21 = vmul.f32 %v1394_v49, %v952_v25  ;;  %1594 = vadd.xlane.f32.xlu0 %v1593_v59  ;;  %1603 = vadd.xlane.f32.xlu1 %v1602_v60  ;;  %v1599_v61 = vsel %vm604_vm0, %v1519_v6, 0.0 }
 0x222   : > { %1482 = vst.msk [vmem:[%s3460_s17 + $0xd8] sm:$0xff] %vm604_vm0, %v1450_v14  ;;  %v1522_v50 = vmul.f32 %v3466_v18, %v1450_v14 }
 0x223   : > { %1481 = vst.msk [vmem:[%s3460_s17 + $0xd0] sm:$0xff] %vm604_vm0, %v1449_v21  ;;  %v2644_v22 = vpop.f32.mrb[38].mxu1  ;;  %v1521_v62 = vmul.f32 %v3466_v18, %v1449_v21  ;;  %v1631_v21 = vld [vmem:[%s4109_s10] sm:$0xff] }
 0x224   : > { %v1452_v17 = vmul.f32 %v2644_v22, %v955_v15  ;;  %v1404_v41 = vpop.f32.mrb[39].mxu1  ;;  %v1608_v29 = vsel %vm604_vm0, %v1522_v50, 0.0  ;;  %v1648_v15 = vld [vmem:[%s4109_s10 + $0x88] sm:$0xff] }
 0x225   : > { %v1451_v2 = vmul.f32 %v1404_v41, %v954_v7  ;;  %1600 = vadd.xlane.f32.xlu0 %v1599_v61  ;;  %1609 = vadd.xlane.f32.xlu1 %v1608_v29  ;;  %v1605_v28 = vsel %vm604_vm0, %v1521_v62, 0.0  ;;  %v1632_v61 = vld [vmem:[%s4109_s10 + $0x8] sm:$0xff] }
 0x226   : > { %1484 = vst.msk [vmem:[%s3460_s17 + $0xe8] sm:$0xff] %vm604_vm0, %v1452_v17  ;;  %v1524_v47 = vmul.f32 %v3466_v18, %v1452_v17  ;;  %v1634_v17 = vld [vmem:[%s4109_s10 + $0x18] sm:$0xff] }
 0x227   : > { %1483 = vst.msk [vmem:[%s3460_s17 + $0xe0] sm:$0xff] %vm604_vm0, %v1451_v2  ;;  %v2647_v10 = vpop.f32.mrb[40].mxu1  ;;  %v1523_v3 = vmul.f32 %v3466_v18, %v1451_v2  ;;  %v1649_v2 = vld [vmem:[%s4109_s10 + $0x90] sm:$0xff] }
 0x228   : > { %v1454_v51 = vmul.f32 %v2647_v10, %v957_v8  ;;  %v1414_v16 = vpop.f32.mrb[41].mxu1  ;;  %v1614_v9 = vsel %vm604_vm0, %v1524_v47, 0.0  ;;  %v1633_v8 = vld [vmem:[%s4109_s10 + $0x10] sm:$0xff] }
 0x229   : > { %v1453_v13 = vmul.f32 %v1414_v16, %v956_v63  ;;  %1606 = vadd.xlane.f32.xlu0 %v1605_v28  ;;  %1615 = vadd.xlane.f32.xlu1 %v1614_v9  ;;  %v1611_v35 = vsel %vm604_vm0, %v1523_v3, 0.0  ;;  %v1652_v28 = vld [vmem:[%s4109_s10 + $0xa8] sm:$0xff] }
 0x22a   : > { %1486 = vst.msk [vmem:[%s3460_s17 + $0xf8] sm:$0xff] %vm604_vm0, %v1454_v51  ;;  %v1526_v56 = vmul.f32 %v3466_v18, %v1454_v51  ;;  %v1636_v3 = vld [vmem:[%s4109_s10 + $0x28] sm:$0xff] }
 0x22b   : > { %1485 = vst.msk [vmem:[%s3460_s17 + $0xf0] sm:$0xff] %vm604_vm0, %v1453_v13  ;;  %v1525_v32 = vmul.f32 %v3466_v18, %v1453_v13  ;;  %v3654_v18 = vld [vmem:[%s4108_s9 + $0x8] sm:$0xff] }
 0x22c   : > { %v1620_v52 = vsel %vm604_vm0, %v1526_v56, 0.0  ;;  %1760 = vmatprep.mubr.f32.mxu0 %v3654_v18 }
 0x22d   : > { %1612 = vadd.xlane.f32.xlu0 %v1611_v35  ;;  %1621 = vadd.xlane.f32.xlu1 %v1620_v52  ;;  %v1617_v19 = vsel %vm604_vm0, %v1525_v32, 0.0  ;;  %v1651_v32 = vld [vmem:[%s4109_s10 + $0xa0] sm:$0xff] }
 0x22e   : > { %v1635_v35 = vld [vmem:[%s4109_s10 + $0x20] sm:$0xff] }
 0x231   : > { %1618 = vadd.xlane.f32.xlu0 %v1617_v19  ;;  %1573 = vadd.xlane.f32.xlu1 %v1572_v48 }
 0x235   : > { %1570 = vadd.xlane.f32.xlu0 %v1569_v4 }
 0x27e   : > { %v1532_v58 = vpop.xlane.xlu1 %1531 }
 0x27f   : > { %v1664_v62 = vmul.f32 %v1632_v61, %v1532_v58 }
 0x282   : > { %v1529_v57 = vpop.xlane.xlu1 %1528 }
 0x283   : > { %v1535_v20 = vpop.xlane.xlu0 %1534  ;;  %v1663_v50 = vmul.f32 %v1631_v21, %v1529_v57  ;;  %v1654_v57 = vld [vmem:[%s4109_s10 + $0xb8] sm:$0xff] }
 0x284   : > { %v1665_v56 = vmul.f32 %v1633_v8, %v1535_v20  ;;  %v1638_v20 = vld [vmem:[%s4109_s10 + $0x38] sm:$0xff] }
 0x285   : > { %v2674_v10 = vpack.c.bf16 %v1664_v62, %v1663_v50  ;;  %v1655_v62 = vld [vmem:[%s4109_s10 + $0xc0] sm:$0xff] }
 0x286   : > { %v1538_v38 = vpop.xlane.xlu1 %1537 }
 0x287   : > { %v1541_v59 = vpop.xlane.xlu0 %1540  ;;  %v1666_v51 = vmul.f32 %v1634_v17, %v1538_v38 }
 0x288   : > { %v1667_v21 = vmul.f32 %v1635_v35, %v1541_v59  ;;  %v1640_v59 = vld [vmem:[%s4109_s10 + $0x48] sm:$0xff] }
 0x289   : > { %v2678_v48 = vpack.c.bf16 %v1666_v51, %v1665_v56 }
 0x28a   : > { %v1544_v5 = vpop.xlane.xlu1 %1543 }
 0x28b   : > { %v1547_v44 = vpop.xlane.xlu0 %1546  ;;  %v1668_v4 = vmul.f32 %v1636_v3, %v1544_v5  ;;  %v1637_v5 = vld [vmem:[%s4109_s10 + $0x30] sm:$0xff] }
 0x28c   : > { %v1657_v3 = vld [vmem:[%s4109_s10 + $0xd0] sm:$0xff] }
 0x28d   : > { %v2682_v50 = vpack.c.bf16 %v1668_v4, %v1667_v21 }
 0x28e   : > { %v1550_v25 = vpop.xlane.xlu1 %1549 }
 0x28f   : > { %v3657_v53 = vpop.xlane.xlu0 %1552 }
 0x292   : > { %v3659_v0 = vpop.xlane.xlu1 %1555 }
 0x293   : > { %v3661_v55 = vpop.xlane.xlu0 %1558 }
 0x296   : > { %v3663_v6 = vpop.xlane.xlu1 %1561 }
 0x297   : > { %v3665_v14 = vpop.xlane.xlu0 %1564 }
 0x29a   : > { %v3667_v49 = vpop.xlane.xlu1 %1567 }
 0x29e   : > { %v1580_v60 = vpop.xlane.xlu0 %1579 }
 0x29f   : > { %v1680_v41 = vmul.f32 %v1648_v15, %v1580_v60  ;;  %v1653_v15 = vld [vmem:[%s4109_s10 + $0xb0] sm:$0xff] }
 0x2a2   : > { %v1577_v7 = vpop.xlane.xlu0 %1576  ;;  %v1586_v22 = vpop.xlane.xlu1 %1585 }
 0x2a3   : > { %v1679_v29 = vmul.f32 %v1647_v54, %v1577_v7  ;;  %v1682_v63 = vmul.f32 %v1650_v1, %v1586_v22  ;;  %v1670_v7 = vmul.f32 %v1638_v20, %v1550_v25  ;;  %v1656_v22 = vld [vmem:[%s4109_s10 + $0xc8] sm:$0xff]  ;;  %v1639_v25 = vld [vmem:[%s4109_s10 + $0x40] sm:$0xff] }
 0x2a5   : > { %v2672_v47 = vpack.c.bf16 %v1680_v41, %v1679_v29  ;;  %v1669_v29 = vmul.f32 %v1637_v5, %v1547_v44  ;;  %v1642_v44 = vld [vmem:[%s4109_s10 + $0x58] sm:$0xff] }
 0x2a6   : > { %v1583_v16 = vpop.xlane.xlu0 %1582  ;;  %v1592_v9 = vpop.xlane.xlu1 %1591 }
 0x2a7   : > { %v1681_v13 = vmul.f32 %v1649_v2, %v1583_v16  ;;  %2673 = vmatprep.subr.bf16.mxu0 %v2672_v47  ;;  %v1684_v19 = vmul.f32 %v1652_v28, %v1592_v9  ;;  %v2686_v47 = vpack.c.bf16 %v1670_v7, %v1669_v29  ;;  %v1671_v28 = vmul.f32 %v1639_v25, %v3657_v53  ;;  %v1658_v9 = vld [vmem:[%s4109_s10 + $0xd8] sm:$0xff]  ;;  %v1644_v53 = vld [vmem:[%s4109_s10 + $0x68] sm:$0xff] }
 0x2a8   : > { %2675 = vmatpush3.bf16.msra.mxu0 %v2674_v10 }
 0x2a9   : > { %v2676_v52 = vpack.c.bf16 %v1682_v63, %v1681_v13  ;;  %v1672_v63 = vmul.f32 %v1640_v59, %v3659_v0  ;;  %v1641_v0 = vld [vmem:[%s4109_s10 + $0x50] sm:$0xff]  ;;  %v1646_v59 = vld [vmem:[%s4109_s10 + $0x78] sm:$0xff] }
 0x2aa   : > { %v1589_v58 = vpop.xlane.xlu0 %1588  ;;  %v1598_v38 = vpop.xlane.xlu1 %1597  ;;  %v1673_v4 = vmul.f32 %v1641_v0, %v3661_v55 }
 0x2ab   : > { %v1683_v60 = vmul.f32 %v1651_v32, %v1589_v58  ;;  %2677 = vmatprep.subr.bf16.mxu0 %v2676_v52  ;;  %v1686_v61 = vmul.f32 %v1654_v57, %v1598_v38  ;;  %v2690_v56 = vpack.c.bf16 %v1672_v63, %v1671_v28  ;;  %v1674_v32 = vmul.f32 %v1642_v44, %v3663_v6  ;;  %v1660_v58 = vld [vmem:[%s4109_s10 + $0xe8] sm:$0xff]  ;;  %v1659_v6 = vld [vmem:[%s4109_s10 + $0xe0] sm:$0xff]  ;;  %v3779_v63 = vld [vmem:[%s4108_s9 + $0x18] sm:$0xff] }
 0x2ac   : > { %2679 = vmatpush3.bf16.msra.mxu0 %v2678_v48  ;;  %v1643_v57 = vld [vmem:[%s4109_s10 + $0x60] sm:$0xff]  ;;  %v3810_v28 = vld [vmem:[%s4108_s9 + $0x30] sm:$0xff] }
 0x2ad   : > { %v2680_v54 = vpack.c.bf16 %v1684_v19, %v1683_v60  ;;  %v2694_v20 = vpack.c.bf16 %v1674_v32, %v1673_v4  ;;  %v1676_v60 = vmul.f32 %v1644_v53, %v3667_v49  ;;  %v3798_v44 = vld [vmem:[%s4108_s9 + $0x20] sm:$0xff] }
 0x2ae   : > { %v1595_v1 = vpop.xlane.xlu0 %1594  ;;  %v1604_v17 = vpop.xlane.xlu1 %1603 }
 0x2af   : > { %v1685_v41 = vmul.f32 %v1653_v15, %v1595_v1  ;;  %2681 = vmatprep.subr.bf16.mxu0 %v2680_v54  ;;  %v1688_v8 = vmul.f32 %v1656_v22, %v1604_v17  ;;  %v1675_v54 = vmul.f32 %v1643_v57, %v3665_v14 }
 0x2b0   : > { %2683 = vmatpush3.bf16.msra.mxu0 %v2682_v50  ;;  %v1661_v50 = vld [vmem:[%s4109_s10 + $0xf0] sm:$0xff] }
 0x2b1   : > { %v2684_v2 = vpack.c.bf16 %v1686_v61, %v1685_v41  ;;  %v1662_v61 = vld [vmem:[%s4109_s10 + $0xf8] sm:$0xff]  ;;  %v2698_v1 = vpack.c.bf16 %v1676_v60, %v1675_v54  ;;  %v1645_v41 = vld [vmem:[%s4109_s10 + $0x70] sm:$0xff] }
 0x2b2   : > { %v1601_v10 = vpop.xlane.xlu0 %1600  ;;  %v1610_v51 = vpop.xlane.xlu1 %1609 }
 0x2b3   : > { %v1687_v16 = vmul.f32 %v1655_v62, %v1601_v10  ;;  %2685 = vmatprep.subr.bf16.mxu0 %v2684_v2  ;;  %v1690_v19 = vmul.f32 %v1658_v9, %v1610_v51  ;;  %v3786_v10 = vld [vmem:[%s4108_s9 + $0x10] sm:$0xff]  ;;  %v3791_v51 = vld [vmem:[%s4108_s9 + $0x28] sm:$0xff]  ;;  %v1781_v9 = vlaneseq }
 0x2b4   : > { %2687 = vmatpush3.bf16.msra.mxu0 %v2686_v47  ;;  %v3774_v47 = vld [vmem:[%s4108_s9] sm:$0xff] }
 0x2b5   : > { %v2688_v13 = vpack.c.bf16 %v1688_v8, %v1687_v16  ;;  %v3803_v16 = vld [vmem:[%s4108_s9 + $0x38] sm:$0xff] }
 0x2b6   : > { %v1607_v35 = vpop.xlane.xlu0 %1606  ;;  %v1616_v52 = vpop.xlane.xlu1 %1615 }
 0x2b7   : > { %v1689_v48 = vmul.f32 %v1657_v3, %v1607_v35  ;;  %2689 = vmatprep.subr.bf16.mxu0 %v2688_v13  ;;  %v1692_v55 = vmul.f32 %v1660_v58, %v1616_v52  ;;  %v1782_v3 = vand.u32 127, %v1781_v9  ;;  %v1832_v9 = vld [vmem:[%s4110_s11 + $0x40] sm:$0xff] }
 0x2b8   : > { %2691 = vmatpush3.bf16.msra.mxu0 %v2690_v56  ;;  %v1695_v56 = vstv %s1487_s27  ;;  %s3980_s27 = scalar_lea.vmem [#allocation3], %s4146_s3  ;;  %s2946_s3 = smov [#allocation3]  }
 0x2b9   : > { %v2692_v38 = vpack.c.bf16 %v1690_v19, %v1689_v48  ;;  %vm1783_vm1 = vcmp.lt.s32.totalorder %v1782_v3, 8  ;;  %v1834_v3 = vld [vmem:[%s4110_s11 + $0x50] sm:$0xff]  ;;  %s2083_s26 = sshll.u32 %s3980_s27, 4  ;;  %s4006_s26 = int_to_ptr.vmem [resolvable:$true] %s2083_s26 }
 0x2ba   : > { %v1613_v21 = vpop.xlane.xlu0 %1612  ;;  %v1622_v15 = vpop.xlane.xlu1 %1621  ;;  %s2849_s2 = scalar_lea.vmem %s4006_s26, 512 }
 0x2bb   : > { %v1691_v5 = vmul.f32 %v1659_v6, %v1613_v21  ;;  %2693 = vmatprep.subr.bf16.mxu0 %v2692_v38  ;;  %v1694_v49 = vmul.f32 %v1662_v61, %v1622_v15  ;;  %v1825_v61 = vld [vmem:[%s4110_s11 + $0x8] sm:$0xff]  ;;  %p2850_p12 = scmp.ne.s32.totalorder %s4006_s26, %s2849_s2 }
 0x2bc   : > { %2695 = vmatpush3.bf16.msra.mxu0 %v2694_v20 }
 0x2bd   : > { %v2696_v7 = vpack.c.bf16 %v1692_v55, %v1691_v5  ;;  %p2851_p13 = pnand %p2850_p12, %p3071_p5 }
 0x2be   : > { %v1619_v22 = vpop.xlane.xlu0 %1618  ;;  %v1574_v14 = vpop.xlane.xlu1 %1573 }
 0x2bf   : > { %v1693_v17 = vmul.f32 %v1661_v50, %v1619_v22  ;;  %2697 = vmatprep.subr.bf16.mxu0 %v2696_v7  ;;  %v1678_v25 = vmul.f32 %v1646_v59, %v1574_v14  ;;  %v1827_v50 = vld [vmem:[%s4110_s11 + $0x18] sm:$0xff]  ;;  %v1824_v7 = vld [vmem:[%s4110_s11] sm:$0xff]  ;;  %v1826_v22 = vld [vmem:[%s4110_s11 + $0x10] sm:$0xff]  ;;  %p2852_p0 = pneg %p2851_p13 }
 0x2c0   : > { %2699 = vmatpush3.bf16.msra.mxu0 %v2698_v1  ;;  %v2704_v1 = vpack.c.bf16 %v1827_v50, %v1825_v61  ;;  %v2706_v59 = vpack.c.bf16 %v1826_v22, %v1824_v7 }
 0x2c1   : > { %v2700_v29 = vpack.c.bf16 %v1694_v49, %v1693_v17  ;;  %v1829_v49 = vld [vmem:[%s4110_s11 + $0x28] sm:$0xff]  ;;  %v1831_v17 = vld [vmem:[%s4110_s11 + $0x38] sm:$0xff] }
 0x2c2   : > { %v1571_v62 = vpop.xlane.xlu0 %1570  ;;  %v2708_v14 = vpack.c.bf16 %v1831_v17, %v1829_v49  ;;  %2705 = vmatprep.subr.bf16.mxu1 %v2704_v1 }
 0x2c3   : > { %v1677_v2 = vmul.f32 %v1645_v41, %v1571_v62  ;;  %2701 = vmatprep.subr.bf16.mxu0 %v2700_v29  ;;  %v1828_v41 = vld [vmem:[%s4110_s11 + $0x20] sm:$0xff]  ;;  %v1830_v29 = vld [vmem:[%s4110_s11 + $0x30] sm:$0xff]  ;;  %v1833_v62 = vld [vmem:[%s4110_s11 + $0x48] sm:$0xff]  ;;  %2707 = vmatpush1.bf16.msra.mxu1 %v2706_v59 }
 0x2c4   : > { %2709 = vmatprep.subr.bf16.mxu1 %v2708_v14 }
 0x2c5   : > { %v2702_v8 = vpack.c.bf16 %v1678_v25, %v1677_v2  ;;  %v1835_v25 = vld [vmem:[%s4110_s11 + $0x58] sm:$0xff]  ;;  %v2710_v2 = vpack.c.bf16 %v1830_v29, %v1828_v41 }
 0x2c7   : > { %2703 = vmatpush3.bf16.msra.mxu0 %v2702_v8  ;;  %v2712_v8 = vpack.c.bf16 %v1835_v25, %v1833_v62  ;;  %2711 = vmatpush1.bf16.msra.mxu1 %v2710_v2  ;;  %v1844_v62 = vld [vmem:[%s4110_s11 + $0xa0] sm:$0xff]  ;;  %v1846_v25 = vld [vmem:[%s4110_s11 + $0xb0] sm:$0xff] }
 0x2c8   : > { %v2726_v2 = vpack.c.bf16 %v1846_v25, %v1844_v62  ;;  %v4144_v62 = vpack.c.bf16 %v3223_v40, %v3220_v39 }
 0x2c9   : > { %2713 = vmatprep.subr.bf16.mxu1 %v2712_v8  ;;  %v1849_v8 = vld [vmem:[%s4110_s11 + $0xc8] sm:$0xff] }
 0x2ca   : > { %1761 = vmatmul.mubr.f32.vlgmr.msra.gmra.mrb[26].mxu0 %v3774_v47 }
 0x2cb   : > { %1765 = vmatprep.mubr.f32.mxu0 %v3779_v63 }
 0x2ce   : > { %1766 = vmatmul.mubr.f32.gmra.mrb[28].mxu0 %v3786_v10 }
 0x2cf   : > { %1770 = vmatprep.mubr.f32.mxu0 %v3791_v51 }
 0x2d2   : > { %1771 = vmatmul.mubr.f32.gmra.mrb[30].mxu0 %v3798_v44 }
 0x2d3   : > { %1775 = vmatprep.mubr.f32.mxu0 %v3803_v16 }
 0x2d6   : > { %1776 = vmatmul.mubr.f32.gmra.mrb[32].mxu0 %v3810_v28 }
 0x39d   : > { %v2466_v0 = vpop.f32.mrb[26].mxu0 }
 0x39e   : > { %v2467_v13 = vpop.f32.mrb[27].mxu0 }
 0x39f   : > { %v2468_v32 = vadd.f32 %v2467_v13, %v2466_v0  ;;  %v1837_v0 = vld [vmem:[%s4110_s11 + $0x68] sm:$0xff]  ;;  %v1839_v13 = vld [vmem:[%s4110_s11 + $0x78] sm:$0xff] }
 0x3a1   : > { %v2469_v35 = vpop.f32.mrb[28].mxu0  ;;  %v1763_v52 = vadd.f32 %v2468_v32, %v1695_v56  ;;  %v2716_v32 = vpack.c.bf16 %v1839_v13, %v1837_v0  ;;  %v1848_v0 = vld [vmem:[%s4110_s11 + $0xc0] sm:$0xff]  ;;  %v1850_v13 = vld [vmem:[%s4110_s11 + $0xd0] sm:$0xff] }
 0x3a2   : > { %v2470_v53 = vpop.f32.mrb[29].mxu0 }
 0x3a3   : > { %v2471_v19 = vadd.f32 %v2470_v53, %v2469_v35  ;;  %v3818_v48 = vsel %vm1783_vm1, %v1763_v52, -1e+30  ;;  %2046 = vst [vmem:[%s3822_s30] sm:$0xff] %v1763_v52  ;;  %v1836_v35 = vld [vmem:[%s4110_s11 + $0x60] sm:$0xff]  ;;  %v1838_v52 = vld [vmem:[%s4110_s11 + $0x70] sm:$0xff]  ;;  %v1841_v53 = vld [vmem:[%s4110_s11 + $0x88] sm:$0xff] }
 0x3a4   : > { %1788 = vmax.xlane.f32.xlu0 %v3818_v48 }
 0x3a5   : > { %v2472_v4 = vpop.f32.mrb[30].mxu0  ;;  %v1768_v58 = vadd.f32 %v2471_v19, %v1695_v56  ;;  %v1843_v19 = vld [vmem:[%s4110_s11 + $0x98] sm:$0xff] }
 0x3a6   : > { %v2473_v6 = vpop.f32.mrb[31].mxu0 }
 0x3a7   : > { %v2474_v57 = vadd.f32 %v2473_v6, %v2472_v4  ;;  %v1785_v38 = vsel %vm1783_vm1, %v1768_v58, -1e+30  ;;  %2047 = vst [vmem:[%s3822_s30 + $0x8] sm:$0xff] %v1768_v58  ;;  %v2718_v4 = vpack.c.bf16 %v1838_v52, %v1836_v35  ;;  %v2720_v58 = vpack.c.bf16 %v1843_v19, %v1841_v53  ;;  %v1840_v6 = vld [vmem:[%s4110_s11 + $0x80] sm:$0xff]  ;;  %v1855_v35 = vld [vmem:[%s4110_s11 + $0xf8] sm:$0xff]  ;;  %v1854_v19 = vld [vmem:[%s4110_s11 + $0xf0] sm:$0xff] }
 0x3a8   : > { %1790 = vmax.xlane.f32.xlu1 %v1785_v38  ;;  %v1852_v53 = vld [vmem:[%s4110_s11 + $0xe0] sm:$0xff] }
 0x3a9   : > { %v2475_v20 = vpop.f32.mrb[32].mxu0  ;;  %v1773_v60 = vadd.f32 %v2474_v57, %v1695_v56  ;;  %v1842_v57 = vld [vmem:[%s4110_s11 + $0x90] sm:$0xff] }
 0x3aa   : > { %v2476_v21 = vpop.f32.mrb[33].mxu0 }
 0x3ab   : > { %v2477_v15 = vadd.f32 %v2476_v21, %v2475_v20  ;;  %v1786_v55 = vsel %vm1783_vm1, %v1773_v60, -1e+30  ;;  %2048 = vst [vmem:[%s3822_s30 + $0x10] sm:$0xff] %v1773_v60  ;;  %v2722_v20 = vpack.c.bf16 %v1842_v57, %v1840_v6  ;;  %v2835_v6 = vld [vmem:[%s3113_s24 + $0x80] sm:$0xff]  ;;  %v2836_v57 = vld [vmem:[%s3113_s24 + $0x88] sm:$0xff] }
 0x3ac   : > { %1792 = vmax.xlane.f32.xlu0 %v1786_v55 }
 0x3ad   : > { %v1778_v5 = vadd.f32 %v2477_v15, %v1695_v56  ;;  %v2714_v56 = vpack.c.bf16 %v1834_v3, %v1832_v9  ;;  %v1851_v9 = vld [vmem:[%s4110_s11 + $0xd8] sm:$0xff] }
 0x3ae   : > { %v2728_v3 = vpack.c.bf16 %v1851_v9, %v1849_v8  ;;  %v2847_v8 = vld [vmem:[%s3113_s24 + $0xf0] sm:$0xff]  ;;  %v2848_v9 = vld [vmem:[%s3113_s24 + $0xf8] sm:$0xff] }
 0x3af   : > { %v1787_v54 = vsel %vm1783_vm1, %v1778_v5, -1e+30  ;;  %2049 = vst [vmem:[%s3822_s30 + $0x18] sm:$0xff] %v1778_v5  ;;  %2715 = vmatpush1.bf16.msra.mxu1 %v2714_v56  ;;  %v2730_v56 = vpack.c.bf16 %v1850_v13, %v1848_v0 }
 0x3b0   : > { %1794 = vmax.xlane.f32.xlu1 %v1787_v54  ;;  %2717 = vmatprep.subr.bf16.mxu1 %v2716_v32  ;;  %v1853_v32 = vld [vmem:[%s4110_s11 + $0xe8] sm:$0xff] }
 0x3b1   : > { %v2732_v52 = vpack.c.bf16 %v1855_v35, %v1853_v32 }
 0x3b3   : > { %2719 = vmatpush1.bf16.msra.mxu1 %v2718_v4  ;;  %v2734_v4 = vpack.c.bf16 %v1854_v19, %v1852_v53 }
 0x3b4   : > { %2721 = vmatprep.subr.bf16.mxu1 %v2720_v58  ;;  %v2945_v58 = vmov 0.0  }
 0x3b5   : > { %1920 = vmatprep.mubr.f32.mxu1 %v2945_v58 }
 0x3b7   : > { %2723 = vmatpush1.bf16.msra.mxu1 %v2722_v20  ;;  %v2736_v20 = vpack.c.bf16 %v2836_v57, %v2835_v6 }
 0x3b9   : > { %2737 = vmatprep.subr.bf16.mxu0 %v2736_v20 }
 0x431   : > { %v1789_v60 = vpop.xlane.xlu0 %1788 }
 0x432   : > { %v1796_v21 = vsub.f32 %v3818_v48, %v1789_v60  ;;  %v2837_v60 = vld [vmem:[%s3113_s24 + $0x90] sm:$0xff] }
 0x434   : > { %v1800_v15 = vmul.f32 1.442695, %v1796_v21  ;;  %v2838_v21 = vld [vmem:[%s3113_s24 + $0x98] sm:$0xff] }
 0x435   : > { %v1791_v5 = vpop.xlane.xlu1 %1790 }
 0x436   : > { %2819 = vpow2.f32 %v1800_v15  ;;  %v1797_v61 = vsub.f32 %v1785_v38, %v1791_v5  ;;  %v2740_v15 = vpack.c.bf16 %v2838_v21, %v2837_v60  ;;  %v4138_v5 = vpack.c.bf16 %v3159_v24, %v3156_v23  ;;  %v2843_v23 = vld [vmem:[%s3113_s24 + $0xc0] sm:$0xff]  ;;  %v2844_v24 = vld [vmem:[%s3113_s24 + $0xc8] sm:$0xff] }
 0x438   : > { %v1802_v50 = vmul.f32 1.442695, %v1797_v61  ;;  %2739 = vmatpush3.bf16.msra.mxu0 %v4138_v5  ;;  %v2839_v61 = vld [vmem:[%s3113_s24 + $0xa0] sm:$0xff] }
 0x439   : > { %v1793_v7 = vpop.xlane.xlu0 %1792  ;;  %2741 = vmatprep.subr.bf16.mxu0 %v2740_v15 }
 0x43a   : > { %2821 = vpow2.f32 %v1802_v50  ;;  %v1798_v1 = vsub.f32 %v1786_v55, %v1793_v7  ;;  %v1845_v55 = vld [vmem:[%s4110_s11 + $0xa8] sm:$0xff] }
 0x43b   : > { %v2840_v50 = vld [vmem:[%s3113_s24 + $0xa8] sm:$0xff] }
 0x43c   : > { %v1804_v22 = vmul.f32 1.442695, %v1798_v1  ;;  %v2744_v7 = vpack.c.bf16 %v2840_v50, %v2839_v61  ;;  %v4139_v1 = vpack.c.bf16 %v3171_v27, %v3168_v26  ;;  %v4142_v26 = vpack.c.bf16 %v3211_v37, %v3208_v36 }
 0x43d   : > { %v1795_v49 = vpop.xlane.xlu1 %1794  ;;  %v4143_v27 = vpack.c.bf16 %v3125_v12, %v3122_v11 }
 0x43e   : > { %2823 = vpow2.f32 %v1804_v22  ;;  %v1799_v17 = vsub.f32 %v1787_v54, %v1795_v49  ;;  %v1847_v54 = vld [vmem:[%s4110_s11 + $0xb8] sm:$0xff]  ;;  %2743 = vmatpush3.bf16.msra.mxu0 %v4139_v1  ;;  %v2841_v22 = vld [vmem:[%s3113_s24 + $0xb0] sm:$0xff] }
 0x43f   : > { %v2724_v29 = vpack.c.bf16 %v1847_v54, %v1845_v55  ;;  %2745 = vmatprep.subr.bf16.mxu0 %v2744_v7  ;;  %v2842_v49 = vld [vmem:[%s3113_s24 + $0xb8] sm:$0xff]  ;;  %v2752_v55 = vpack.c.bf16 %v2844_v24, %v2843_v23  ;;  %v4141_v54 = vpack.c.bf16 %v3199_v34, %v3196_v33  ;;  %v4145_v33 = vpack.c.bf16 %v3235_v43, %v3232_v42 }
 0x440   : > { %v3893_v59 = vpop.eup %2819  ;;  %v1806_v14 = vmul.f32 1.442695, %v1799_v17  ;;  %v2748_v17 = vpack.c.bf16 %v2842_v49, %v2841_v22 }
 0x441   : > { %1808 = vadd.xlane.f32.xlu0 %v3893_v59  ;;  %2725 = vmatprep.subr.bf16.mxu1 %v2724_v29  ;;  %v2845_v29 = vld [vmem:[%s3113_s24 + $0xe0] sm:$0xff] }
 0x442   : > { %2825 = vpow2.f32 %v1806_v14  ;;  %2727 = vmatpush1.bf16.msra.mxu1 %v2726_v2  ;;  %v4140_v14 = vpack.c.bf16 %v3187_v31, %v3184_v30  ;;  %v2846_v30 = vld [vmem:[%s3113_s24 + $0xe8] sm:$0xff]  ;;  %s2099_s24 = sshll.u32 %s3822_s30, 4  ;;  %s2056_s30 = scalar_lea.sflag [#allocation4], %s3814_s22  ;;  %s4004_s24 = int_to_ptr.vmem [resolvable:$true] %s2099_s24 }
 0x443   : > { %2729 = vmatprep.subr.bf16.mxu1 %v2728_v3  ;;  %v2760_v31 = vpack.c.bf16 %v2846_v30, %v2845_v29  ;;  %v2764_v3 = vpack.c.bf16 %v2848_v9, %v2847_v8 }
 0x444   : > { %v3896_v41 = vpop.eup %2821  ;;  %2747 = vmatpush3.bf16.msra.mxu0 %v4140_v14 }
 0x445   : > { %1810 = vadd.xlane.f32.xlu1 %v3896_v41  ;;  %2749 = vmatprep.subr.bf16.mxu0 %v2748_v17 }
 0x446   : > { %2731 = vmatpush1.bf16.msra.mxu1 %v2730_v56 }
 0x447   : > { %2733 = vmatprep.subr.bf16.mxu1 %v2732_v52 }
 0x448   : > { %v3899_v48 = vpop.eup %2823  ;;  %2751 = vmatpush3.bf16.msra.mxu0 %v4141_v54 }
 0x449   : > { %1812 = vadd.xlane.f32.xlu0 %v3899_v48  ;;  %2753 = vmatprep.subr.bf16.mxu0 %v2752_v55 }
 0x44a   : > { %2735 = vmatpush1.bf16.msra.mxu1 %v2734_v4 }
 0x44c   : > { %v3902_v38 = vpop.eup %2825  ;;  %2755 = vmatpush3.bf16.msra.mxu0 %v4142_v26 }
 0x44d   : > { %1814 = vadd.xlane.f32.xlu1 %v3902_v38  ;;  %2757 = vmatprep.subr.bf16.mxu0 %v4143_v27 }
 0x450   : > { %2759 = vmatpush3.bf16.msra.mxu0 %v4144_v62 }
 0x451   : > { %2761 = vmatprep.subr.bf16.mxu0 %v2760_v31 }
 0x454   : > { %2763 = vmatpush3.bf16.msra.mxu0 %v4145_v33 }
 0x455   : > { %2765 = vmatprep.subr.bf16.mxu0 %v2764_v3 }
 0x4ce   : > { %v1809_v34 = vpop.xlane.xlu0 %1808 }
 0x4cf   : > { %2827 = vrcp.f32 %v1809_v34 }
 0x4d2   : > { %v1811_v36 = vpop.xlane.xlu1 %1810 }
 0x4d3   : > { %2829 = vrcp.f32 %v1811_v36 }
 0x4d6   : > { %v1813_v37 = vpop.xlane.xlu0 %1812 }
 0x4d7   : > { %2831 = vrcp.f32 %v1813_v37 }
 0x4d9   : > { %v2828_v11 = vpop.eup %2827 }
 0x4da   : > { %v1817_v12 = vmul.f32 %v2828_v11, %v3893_v59  ;;  %v1815_v25 = vpop.xlane.xlu1 %1814 }
 0x4db   : > { %2833 = vrcp.f32 %v1815_v25 }
 0x4dc   : > { %1921 = vmatmul.mubr.f32.vlgmr.msra.gmra.mrb[42].mxu1 %v1817_v12  ;;  %2042 = vst [vmem:[%s3980_s27] sm:$0xff] %v1817_v12 }
 0x4dd   : > { %v2830_v39 = vpop.eup %2829  ;;  %1926 = vmatprep.mubr.f32.mxu1 %v2945_v58 }
 0x4de   : > { %v1819_v40 = vmul.f32 %v2830_v39, %v3896_v41  ;;  %v4147_v41 = vpack.c.bf16 %v3247_v46, %v3244_v45 }
 0x4e0   : > { %1927 = vmatmul.mubr.f32.gmra.mrb[44].mxu1 %v1819_v40  ;;  %2043 = vst [vmem:[%s3980_s27 + $0x8] sm:$0xff] %v1819_v40  ;;  %2767 = vmatpush3.bf16.msra.mxu0 %v4147_v41 }
 0x4e1   : > { %v2832_v42 = vpop.eup %2831  ;;  %1932 = vmatprep.mubr.f32.mxu1 %v2945_v58 }
 0x4e2   : > { %v1821_v43 = vmul.f32 %v2832_v42, %v3899_v48 }
 0x4e4   : > { %1933 = vmatmul.mubr.f32.gmra.mrb[46].mxu1 %v1821_v43  ;;  %2044 = vst [vmem:[%s3980_s27 + $0x10] sm:$0xff] %v1821_v43 }
 0x4e5   : > { %v2834_v59 = vpop.eup %2833  ;;  %1938 = vmatprep.mubr.f32.mxu1 %v2945_v58 }
 0x4e6   : > { %v1823_v2 = vmul.f32 %v2834_v59, %v3902_v38 }
 0x4e8   : > { %1939 = vmatmul.mubr.f32.gmra.mrb[48].mxu1 %v1823_v2  ;;  %2045 = vst [vmem:[%s3980_s27 + $0x18] sm:$0xff] %v1823_v2  ;;  %s2853_s27 = sshll.u32 %s2946_s3, 4  ;;  %s2854_s27 = int_to_ptr.vmem [resolvable:$false] %s2853_s27 }
 0x4e9   : > { %s2855_s7 = scalar_lea.vmem %s2854_s27, 1024  ;;  %p2856_p1 = scmp.lt.s32.totalorder %s4006_s26, %s2854_s27 }
 0x4ea   : > { %p2857_p2 = scmp.lt.s32.totalorder %s2855_s7, %s2849_s2 }
 0x4ec   : > { %p2858_p3 = por %p2857_p2, %p2856_p1 }
 0x4ee   : > { %p2859_p4 = pnand %p2858_p3, %p2852_p0 }
 0x5af   : > { %v1922_v0 = vpop.f32.mrb[42].mxu1 }
 0x5b0   : > { %v1924_v13 = vpop.f32.mrb[43].mxu1  ;;  %v1945_v56 = vmul.f32 %v1922_v0, %v3774_v47 }
 0x5b1   : > { %v1946_v48 = vmul.f32 %v1924_v13, %v3654_v18 }
 0x5b3   : > { %v1928_v32 = vpop.f32.mrb[44].mxu1  ;;  %2017 = vmatprep.mubr.f32.mxu0 %v1946_v48 }
 0x5b4   : > { %v1930_v35 = vpop.f32.mrb[45].mxu1  ;;  %2018 = vmatmul.mubr.f32.vlgmr.msra.gmra.mrb[34].mxu0 %v1945_v56  ;;  %v1947_v52 = vmul.f32 %v1928_v32, %v3786_v10 }
 0x5b5   : > { %v1948_v38 = vmul.f32 %v1930_v35, %v3779_v63 }
 0x5b7   : > { %v1934_v53 = vpop.f32.mrb[46].mxu1  ;;  %2022 = vmatprep.mubr.f32.mxu0 %v1948_v38 }
 0x5b8   : > { %v1936_v45 = vpop.f32.mrb[47].mxu1  ;;  %2023 = vmatmul.mubr.f32.gmra.mrb[36].mxu0 %v1947_v52  ;;  %v1949_v18 = vmul.f32 %v1934_v53, %v3798_v44 }
 0x5b9   : > { %v1950_v46 = vmul.f32 %v1936_v45, %v3791_v51 }
 0x5bb   : > { %v1940_v47 = vpop.f32.mrb[48].mxu1  ;;  %2027 = vmatprep.mubr.f32.mxu0 %v1950_v46 }
 0x5bc   : > { %v1942_v19 = vpop.f32.mrb[49].mxu1  ;;  %2028 = vmatmul.mubr.f32.gmra.mrb[38].mxu0 %v1949_v18  ;;  %v1951_v10 = vmul.f32 %v1940_v47, %v3810_v28 }
 0x5bd   : > { %v1952_v63 = vmul.f32 %v1942_v19, %v3803_v16 }
 0x5bf   : > { %2032 = vmatprep.mubr.f32.mxu0 %v1952_v63 }
 0x5c0   : > { %2033 = vmatmul.mubr.f32.gmra.mrb[40].mxu0 %v1951_v10 }
 0x5c1   : > { %2862 = shalt.err (!%p2859_p4)
}
 0x5c2   : > { %s2863_s16 = scalar_lea.hbm %s4012_s0, 512  ;;  %s2867_s19 = scalar_lea.hbm %s4112_s13, 1024 }
 0x5c3   : > { %p2864_p7 = scmp.ne.s32.totalorder %s4012_s0, %s2863_s16  ;;  %p2868_p10 = scmp.lt.u32.totalorder %s4012_s0, %s4112_s13 }
 0x5c4   : > { %p2869_p11 = scmp.lt.u32.totalorder %s2867_s19, %s2863_s16  ;;  %p2871_p13 = scmp.lt.u32.totalorder %s2863_s16, %s4012_s0 }
 0x5c5   : > { %p2865_p8 = pnand %p2864_p7, %p3071_p5 }
 0x5c6   : > { %p2870_p12 = por %p2869_p11, %p2868_p10 }
 0x5c7   : > { %p2866_p9 = pneg %p2865_p8 }
 0x5c8   : > { %p2872_p0 = por %p2871_p13, %p2870_p12 }
 0x5ca   : > { %p2873_p1 = pnand %p2872_p0, %p2866_p9 }
 0x5cc   : > { %2876 = shalt.err (!%p2873_p1)
}
 0x5cd   : > { %s2947_s2 = smov 128   ;;  %s2948_s27 = smov 8  }
 0x5ce   : > { %2772 = dma.vmem_to_hbm [thread:$0]  (%p3071_p5), %s4006_s26, 512, %s4012_s0, %s2056_s30, %s2947_s2, %s2947_s2, %s2948_s27  }
 0x5cf   : > { %s2061_s7 = scalar_lea.sflag [#allocation6], %s3814_s22  ;;  %s2877_s16 = scalar_lea.vmem %s4004_s24, 512 }
 0x5d0   : > { %p2878_p2 = scmp.ne.s32.totalorder %s4004_s24, %s2877_s16  ;;  %s2949_s17 = smov [#allocation5]  }
 0x5d1   : > { %s2881_s18 = sshll.u32 %s2949_s17, 4  ;;  %s2882_s18 = int_to_ptr.vmem [resolvable:$false] %s2881_s18 }
 0x5d2   : > { %p2879_p3 = pnand %p2878_p2, %p3071_p5  ;;  %s2883_s19 = scalar_lea.vmem %s2882_s18, 1024 }
 0x5d3   : > { %p2884_p7 = scmp.lt.s32.totalorder %s4004_s24, %s2882_s18  ;;  %p2885_p8 = scmp.lt.s32.totalorder %s2883_s19, %s2877_s16 }
 0x5d4   : > { %p2880_p4 = pneg %p2879_p3 }
 0x5d5   : > { %p2886_p9 = por %p2885_p8, %p2884_p7 }
 0x5d7   : > { %p2887_p10 = pnand %p2886_p9, %p2880_p4 }
 0x5d9   : > { %2890 = shalt.err (!%p2887_p10)
}
 0x5da   : > { %s2891_s26 = scalar_lea.hbm %s4017_s1, 512  ;;  %s2895_s25 = scalar_lea.hbm %s4113_s14, 1024 }
 0x5db   : > { %p2892_p11 = scmp.ne.s32.totalorder %s4017_s1, %s2891_s26  ;;  %p2896_p0 = scmp.lt.u32.totalorder %s4017_s1, %s4113_s14 }
 0x5dc   : > { %p2897_p1 = scmp.lt.u32.totalorder %s2895_s25, %s2891_s26  ;;  %p2899_p3 = scmp.lt.u32.totalorder %s2891_s26, %s4017_s1 }
 0x5dd   : > { %p2893_p12 = pnand %p2892_p11, %p3071_p5 }
 0x5de   : > { %p2898_p2 = por %p2897_p1, %p2896_p0 }
 0x5df   : > { %p2894_p13 = pneg %p2893_p12 }
 0x5e0   : > { %p2900_p4 = por %p2899_p3, %p2898_p2 }
 0x5e2   : > { %p2901_p7 = pnand %p2900_p4, %p2894_p13 }
 0x5e4   : > { %2904 = shalt.err (!%p2901_p7)
}
 0x5e5   : > { %2773 = dma.vmem_to_hbm [thread:$0]  (%p3071_p5), %s4004_s24, 512, %s4017_s1, %s2061_s7, %s2947_s2, %s2947_s2, %s2948_s27  }
 0x5e6   : > { %s4148_s16 = sshll.u32 %s4158_s28, 3 }
 0x5e7   : > { %s547_s26 = scalar_lea.vmem %s4111_s12, %s4148_s16 }
 0x687   : > { %v2510_v51 = vpop.f32.mrb[34].mxu0 }
 0x688   : > { %v2511_v44 = vpop.f32.mrb[35].mxu0 }
 0x689   : > { %v2512_v16 = vadd.f32 %v2511_v44, %v2510_v51 }
 0x68b   : > { %2038 = vst.msk [vmem:[%s547_s26] sm:$0xff] %vm604_vm0, %v2512_v16  ;;  %v2513_v28 = vpop.f32.mrb[36].mxu0 }
 0x68c   : > { %v2514_v4 = vpop.f32.mrb[37].mxu0 }
 0x68d   : > { %v2515_v58 = vadd.f32 %v2514_v4, %v2513_v28 }
 0x68f   : > { %2039 = vst.msk [vmem:[%s547_s26 + $0x8] sm:$0xff] %vm604_vm0, %v2515_v58  ;;  %v2516_v6 = vpop.f32.mrb[38].mxu0 }
 0x690   : > { %v2517_v57 = vpop.f32.mrb[39].mxu0 }
 0x691   : > { %v2518_v20 = vadd.f32 %v2517_v57, %v2516_v6 }
 0x693   : > { %2040 = vst.msk [vmem:[%s547_s26 + $0x10] sm:$0xff] %vm604_vm0, %v2518_v20  ;;  %v2519_v60 = vpop.f32.mrb[40].mxu0 }
 0x694   : > { %v2520_v21 = vpop.f32.mrb[41].mxu0 }
 0x695   : > { %v2521_v15 = vadd.f32 %v2520_v21, %v2519_v60 }
 0x697   : > { %2041 = vst.msk [vmem:[%s547_s26 + $0x18] sm:$0xff] %vm604_vm0, %v2521_v15 }
 0x698 PF: > { %p2783_p5 = scmp.ge.s32.totalorder %s2943_s23, 2  ;;  %s2126_s29 = sand.u32 1, %s2931_s20  }
 0x699   : > { %s2127_s22 = scalar_lea.sflag [#allocation4], %s2126_s29 }
 0x69a   : > { %p2777_p8 = pnand %p2783_p5, %p3075_p6 }
 0x69c   : > { %2922 = dma.done.wait (!%p2777_p8), %s2127_s22, 512  }
 0x69d   : > { %2924 = vsyncadd (!%p2777_p8), %s2127_s22, 4294966784  ;;  %s2136_s24 = scalar_lea.sflag [#allocation6], %s2126_s29 }
 0x69e   : > { %2926 = dma.done.wait (!%p2777_p8), %s2136_s24, 512  }
 0x69f   : > { %2928 = vsyncadd (!%p2777_p8), %s2136_s24, 4294966784  ;;  %s4150_s23 = sld [smem:[#allocation10_spill]]  ;;  %s4151_s1 = sld [smem:[#allocation9_spill]] }
 0x6a0   : > { %s4152_s22 = sld [smem:[#allocation11_spill]]  ;;  %s4153_s20 = smov %s2935_s21 }
 0x6a5   : > { %p30_p9 = scmp.ge.s32.totalorder %s4150_s23, 4   ;;  %s4154_s21 = smov %s4151_s1 }
 0x6a7   :  { %32 = sbr.rel (!%p30_p9) target bundleno = 11 (0xb), region = 147 }
 0x6ae   :  { %2149 = vsyncpa [#allocation4], 1 }
 0x6af   :  { %2151 = vsyncpa [#allocation4 + $0x1], 1 }
 0x6b0   :  { %2152 = vsyncpa [#allocation6], 1 }
 0x6b1   :  { %2154 = vsyncpa [#allocation6 + $0x1], 1 }

</bundles_post_ra>
